<compile_context>
chip_gen: v7x
topology: tpu7x:2x2x1
jax: 0.10.0
libtpu: 0.0.40
codegen_flags: <defaults>
</compile_context>

<pallas_src>
import jax
import jax.numpy as jnp
from jax.experimental import pallas as pl
from jax.experimental.pallas import tpu as pltpu

_HID = 10  # hidden width of the module


def circle_mlp_kernel(x_ref, w1_ref, b1_ref, w2_ref, b2_ref, w3_ref, b3_ref,
                      o_ref):
    # x_ref: [2, rows, 128] f32 in VMEM -- batch folded onto sublanes AND lanes.
    # w*/b* refs: SMEM, read as scalars (sreg) and splat onto vregs.
    x0 = x_ref[0]                                   # [rows, 128]
    x1 = x_ref[1]                                   # [rows, 128]

    # ---- layer 1: Linear(2 -> 10) + ReLU, scalar-weight broadcast FMAs ------
    h1 = [
        jnp.maximum(w1_ref[j, 0] * x0 + w1_ref[j, 1] * x1 + b1_ref[j], 0.0)
        for j in range(_HID)
    ]                                               # 10 x [rows, 128]

    # ---- layer 2: Linear(10 -> 10) + ReLU, 2-way interleaved accumulators ---
    h2 = []
    for j in range(_HID):
        acc_a = w2_ref[j, 0] * h1[0] + b2_ref[j]
        acc_b = w2_ref[j, 1] * h1[1]
        for k in range(2, _HID, 2):
            acc_a = acc_a + w2_ref[j, k] * h1[k]
            acc_b = acc_b + w2_ref[j, k + 1] * h1[k + 1]
        h2.append(jnp.maximum(acc_a + acc_b, 0.0))  # [rows, 128]

    # ---- layer 3: Linear(10 -> 1), dense lane-full output slab --------------
    y_a = w3_ref[0] * h2[0] + b3_ref[0]
    y_b = w3_ref[1] * h2[1]
    for k in range(2, _HID, 2):
        y_a = y_a + w3_ref[k] * h2[k]
        y_b = y_b + w3_ref[k + 1] * h2[k + 1]

    o_ref[...] = (y_a + y_b).astype(o_ref.dtype)    # [rows, 128], unmasked vst


def _round_up(n, m):
    return -(-n // m) * m


def circle_model_forward(x, params, *, tile_batch=32768, xla_bypass_below=4096):
    """x: [N, 2] float32 (PyTorch layout). Returns [N, 1] float32 logits."""
    w1, b1, w2, b2, w3, b3 = params
    N, fin = x.shape
    assert fin == 2 and w1.shape == (_HID, 2)

    # Small batches: XLA fusion beats kernel launch + layout pass + grid setup.
    if N < xla_bypass_below:
        h1 = jnp.maximum(x @ w1.T + b1[:, 0], 0.0)
        h2 = jnp.maximum(h1 @ w2.T + b2[:, 0], 0.0)
        return h2 @ w3.T + b3[:, 0]

    assert tile_batch % 1024 == 0 and tile_batch <= 65536
    n_pad = _round_up(N, 1024)                 # fold cleanly into [8,128] vregs
    tb = min(tile_batch, n_pad)
    n_pad = _round_up(n_pad, tb)               # grid divides evenly (<= tb-1 waste)
    rows = tb // 128                           # sublane rows per grid step
    r_total = n_pad // 128

    # Single layout pass: [N,2] -> feature-major dense [2, n_pad/128, 128].
    # (If x already arrives feature-major upstream, this pass can be dropped.)
    x_p = x if n_pad == N else jnp.pad(x, ((0, n_pad - N), (0, 0)))
    x_t = x_p.T.reshape(2, r_total, 128)

    smem = pl.BlockSpec(memory_space=pltpu.MemorySpace.SMEM)  # tiny resident weights
    grid = (n_pad // tb,)

    # Per-step VMEM: 2x double-buffered [2,rows,128] in + [rows,128] out
    # + ~20 [rows,128] h1/h2 temporaries -> < 8 MiB at tb=65536.
    io_bytes = 2 * (2 * tb * 4) + 2 * (tb * 4)
    tmp_bytes = 24 * tb * 4
    vmem_limit = min(48 * 1024 * 1024,
                     max(32 * 1024 * 1024, 2 * (io_bytes + tmp_bytes)))

    out = pl.pallas_call(
        circle_mlp_kernel,
        out_shape=jax.ShapeDtypeStruct((r_total, 128), jnp.float32),
        grid_spec=pltpu.PrefetchScalarGridSpec(
            num_scalar_prefetch=0,
            grid=grid,
            in_specs=[
                pl.BlockSpec((2, rows, 128), lambda i: (0, i, 0)),  # x, dense
                smem, smem, smem, smem, smem, smem,                  # weights/biases
            ],
            out_specs=pl.BlockSpec((rows, 128), lambda i: (i, 0)),
        ),
        compiler_params=pltpu.CompilerParams(
            dimension_semantics=("parallel",),   # batch tiles shard across v7x's 2 TCs
            vmem_limit_bytes=vmem_limit,
        ),
    )(x_t,
      w1, b1.reshape(-1),
      w2, b2.reshape(-1),
      w3.reshape(-1), b3.reshape(-1))

    return out.reshape(n_pad)[:N].reshape(N, 1)


def init_params(key):
    """nn.Linear-style U(-1/sqrt(fan_in), 1/sqrt(fan_in)); PyTorch [out, in] layout."""
    dims = [(_HID, 2), (_HID, _HID), (1, _HID)]
    keys = jax.random.split(key, 2 * len(dims))
    params = []
    for i, (fout, fin) in enumerate(dims):
        bound = 1.0 / (fin ** 0.5)
        w = jax.random.uniform(keys[2 * i], (fout, fin), jnp.float32, -bound, bound)
        b = jax.random.uniform(keys[2 * i + 1], (fout, 1), jnp.float32, -bound, bound)
        params.extend([w, b])
    return tuple(params)


if __name__ == "__main__":
    key = jax.random.PRNGKey(0)
    kx, kp = jax.random.split(key)

    # Small-but-kernel-exercising batch of 2-D "circle" points: 6144 points,
    # tile_batch=2048 -> grid = (3,), rows = 16 per step.
    N = 6144
    x = jax.random.normal(kx, (N, 2), jnp.float32)
    params = init_params(kp)
    w1, b1, w2, b2, w3, b3 = params

    out = circle_model_forward(x, params, tile_batch=2048)
    out = jax.block_until_ready(out)

    # Plain-JAX reference (same math as the PyTorch module).
    h1 = jnp.maximum(x @ w1.T + b1[:, 0], 0.0)
    h2 = jnp.maximum(h1 @ w2.T + b2[:, 0], 0.0)
    ref = h2 @ w3.T + b3[:, 0]                      # [N, 1]

    assert out.shape == (N, 1)
    max_err = float(jnp.max(jnp.abs(out - ref)))
    assert jnp.allclose(out, ref, atol=1e-4, rtol=1e-4), max_err

    print("KERNEL_OK")
</pallas_src>

<mosaic_0001>
module attributes {stable_mosaic.version = 11 : i64} {
  func.func @circle_mlp_kernel(%arg0: i32, %arg1: memref<2x16x128xf32, #tpu.memory_space<vmem>>, %arg2: memref<10x2xf32, #tpu.memory_space<smem>>, %arg3: memref<10xf32, #tpu.memory_space<smem>>, %arg4: memref<10x10xf32, #tpu.memory_space<smem>>, %arg5: memref<10xf32, #tpu.memory_space<smem>>, %arg6: memref<10xf32, #tpu.memory_space<smem>>, %arg7: memref<1xf32, #tpu.memory_space<smem>>, %arg8: memref<16x128xf32, #tpu.memory_space<vmem>>) attributes {dimension_semantics = [#tpu.dimension_semantics<parallel>], iteration_bounds = array<i64: 3>, scalar_prefetch = 0 : i64, scratch_operands = 0 : i64, tpu.core_type = #tpu.core_type<tc>, window_params = [{transform_indices = @transform_0, window_bounds = array<i64: 2, 16, 128>}, {transform_indices = @transform_1, window_bounds = array<i64: 10, 2>}, {transform_indices = @transform_2, window_bounds = array<i64: 10>}, {transform_indices = @transform_3, window_bounds = array<i64: 10, 10>}, {transform_indices = @transform_4, window_bounds = array<i64: 10>}, {transform_indices = @transform_5, window_bounds = array<i64: 10>}, {transform_indices = @transform_6, window_bounds = array<i64: 1>}, {transform_indices = @transform_7, window_bounds = array<i64: 16, 128>}]} {
    %c0 = arith.constant 0 : index
    %c0_0 = arith.constant 0 : index
    %c0_1 = arith.constant 0 : index
    %0 = vector.load %arg1[%c0, %c0_0, %c0_1] : memref<2x16x128xf32, #tpu.memory_space<vmem>>, vector<1x16x128xf32>
    %1 = vector.shape_cast %0 : vector<1x16x128xf32> to vector<16x128xf32>
    %c1 = arith.constant 1 : index
    %c0_2 = arith.constant 0 : index
    %c0_3 = arith.constant 0 : index
    %2 = vector.load %arg1[%c1, %c0_2, %c0_3] : memref<2x16x128xf32, #tpu.memory_space<vmem>>, vector<1x16x128xf32>
    %3 = vector.shape_cast %2 : vector<1x16x128xf32> to vector<16x128xf32>
    %c0_4 = arith.constant 0 : index
    %c0_5 = arith.constant 0 : index
    %4 = memref.load %arg2[%c0_4, %c0_5] : memref<10x2xf32, #tpu.memory_space<smem>>
    %5 = vector.broadcast %4 : f32 to vector<16x128xf32>
    %6 = arith.mulf %5, %1 : vector<16x128xf32>
    %c0_6 = arith.constant 0 : index
    %c1_7 = arith.constant 1 : index
    %7 = memref.load %arg2[%c0_6, %c1_7] : memref<10x2xf32, #tpu.memory_space<smem>>
    %8 = vector.broadcast %7 : f32 to vector<16x128xf32>
    %9 = arith.mulf %8, %3 : vector<16x128xf32>
    %10 = arith.addf %6, %9 : vector<16x128xf32>
    %c0_8 = arith.constant 0 : index
    %11 = memref.load %arg3[%c0_8] : memref<10xf32, #tpu.memory_space<smem>>
    %12 = vector.broadcast %11 : f32 to vector<16x128xf32>
    %13 = arith.addf %10, %12 : vector<16x128xf32>
    %cst = arith.constant 0.000000e+00 : f32
    %14 = vector.broadcast %cst : f32 to vector<16x128xf32>
    %15 = arith.maximumf %13, %14 : vector<16x128xf32>
    %c1_9 = arith.constant 1 : index
    %c0_10 = arith.constant 0 : index
    %16 = memref.load %arg2[%c1_9, %c0_10] : memref<10x2xf32, #tpu.memory_space<smem>>
    %17 = vector.broadcast %16 : f32 to vector<16x128xf32>
    %18 = arith.mulf %17, %1 : vector<16x128xf32>
    %c1_11 = arith.constant 1 : index
    %c1_12 = arith.constant 1 : index
    %19 = memref.load %arg2[%c1_11, %c1_12] : memref<10x2xf32, #tpu.memory_space<smem>>
    %20 = vector.broadcast %19 : f32 to vector<16x128xf32>
    %21 = arith.mulf %20, %3 : vector<16x128xf32>
    %22 = arith.addf %18, %21 : vector<16x128xf32>
    %c1_13 = arith.constant 1 : index
    %23 = memref.load %arg3[%c1_13] : memref<10xf32, #tpu.memory_space<smem>>
    %24 = vector.broadcast %23 : f32 to vector<16x128xf32>
    %25 = arith.addf %22, %24 : vector<16x128xf32>
    %cst_14 = arith.constant 0.000000e+00 : f32
    %26 = vector.broadcast %cst_14 : f32 to vector<16x128xf32>
    %27 = arith.maximumf %25, %26 : vector<16x128xf32>
    %c2 = arith.constant 2 : index
    %c0_15 = arith.constant 0 : index
    %28 = memref.load %arg2[%c2, %c0_15] : memref<10x2xf32, #tpu.memory_space<smem>>
    %29 = vector.broadcast %28 : f32 to vector<16x128xf32>
    %30 = arith.mulf %29, %1 : vector<16x128xf32>
    %c2_16 = arith.constant 2 : index
    %c1_17 = arith.constant 1 : index
    %31 = memref.load %arg2[%c2_16, %c1_17] : memref<10x2xf32, #tpu.memory_space<smem>>
    %32 = vector.broadcast %31 : f32 to vector<16x128xf32>
    %33 = arith.mulf %32, %3 : vector<16x128xf32>
    %34 = arith.addf %30, %33 : vector<16x128xf32>
    %c2_18 = arith.constant 2 : index
    %35 = memref.load %arg3[%c2_18] : memref<10xf32, #tpu.memory_space<smem>>
    %36 = vector.broadcast %35 : f32 to vector<16x128xf32>
    %37 = arith.addf %34, %36 : vector<16x128xf32>
    %cst_19 = arith.constant 0.000000e+00 : f32
    %38 = vector.broadcast %cst_19 : f32 to vector<16x128xf32>
    %39 = arith.maximumf %37, %38 : vector<16x128xf32>
    %c3 = arith.constant 3 : index
    %c0_20 = arith.constant 0 : index
    %40 = memref.load %arg2[%c3, %c0_20] : memref<10x2xf32, #tpu.memory_space<smem>>
    %41 = vector.broadcast %40 : f32 to vector<16x128xf32>
    %42 = arith.mulf %41, %1 : vector<16x128xf32>
    %c3_21 = arith.constant 3 : index
    %c1_22 = arith.constant 1 : index
    %43 = memref.load %arg2[%c3_21, %c1_22] : memref<10x2xf32, #tpu.memory_space<smem>>
    %44 = vector.broadcast %43 : f32 to vector<16x128xf32>
    %45 = arith.mulf %44, %3 : vector<16x128xf32>
    %46 = arith.addf %42, %45 : vector<16x128xf32>
    %c3_23 = arith.constant 3 : index
    %47 = memref.load %arg3[%c3_23] : memref<10xf32, #tpu.memory_space<smem>>
    %48 = vector.broadcast %47 : f32 to vector<16x128xf32>
    %49 = arith.addf %46, %48 : vector<16x128xf32>
    %cst_24 = arith.constant 0.000000e+00 : f32
    %50 = vector.broadcast %cst_24 : f32 to vector<16x128xf32>
    %51 = arith.maximumf %49, %50 : vector<16x128xf32>
    %c4 = arith.constant 4 : index
    %c0_25 = arith.constant 0 : index
    %52 = memref.load %arg2[%c4, %c0_25] : memref<10x2xf32, #tpu.memory_space<smem>>
    %53 = vector.broadcast %52 : f32 to vector<16x128xf32>
    %54 = arith.mulf %53, %1 : vector<16x128xf32>
    %c4_26 = arith.constant 4 : index
    %c1_27 = arith.constant 1 : index
    %55 = memref.load %arg2[%c4_26, %c1_27] : memref<10x2xf32, #tpu.memory_space<smem>>
    %56 = vector.broadcast %55 : f32 to vector<16x128xf32>
    %57 = arith.mulf %56, %3 : vector<16x128xf32>
    %58 = arith.addf %54, %57 : vector<16x128xf32>
    %c4_28 = arith.constant 4 : index
    %59 = memref.load %arg3[%c4_28] : memref<10xf32, #tpu.memory_space<smem>>
    %60 = vector.broadcast %59 : f32 to vector<16x128xf32>
    %61 = arith.addf %58, %60 : vector<16x128xf32>
    %cst_29 = arith.constant 0.000000e+00 : f32
    %62 = vector.broadcast %cst_29 : f32 to vector<16x128xf32>
    %63 = arith.maximumf %61, %62 : vector<16x128xf32>
    %c5 = arith.constant 5 : index
    %c0_30 = arith.constant 0 : index
    %64 = memref.load %arg2[%c5, %c0_30] : memref<10x2xf32, #tpu.memory_space<smem>>
    %65 = vector.broadcast %64 : f32 to vector<16x128xf32>
    %66 = arith.mulf %65, %1 : vector<16x128xf32>
    %c5_31 = arith.constant 5 : index
    %c1_32 = arith.constant 1 : index
    %67 = memref.load %arg2[%c5_31, %c1_32] : memref<10x2xf32, #tpu.memory_space<smem>>
    %68 = vector.broadcast %67 : f32 to vector<16x128xf32>
    %69 = arith.mulf %68, %3 : vector<16x128xf32>
    %70 = arith.addf %66, %69 : vector<16x128xf32>
    %c5_33 = arith.constant 5 : index
    %71 = memref.load %arg3[%c5_33] : memref<10xf32, #tpu.memory_space<smem>>
    %72 = vector.broadcast %71 : f32 to vector<16x128xf32>
    %73 = arith.addf %70, %72 : vector<16x128xf32>
    %cst_34 = arith.constant 0.000000e+00 : f32
    %74 = vector.broadcast %cst_34 : f32 to vector<16x128xf32>
    %75 = arith.maximumf %73, %74 : vector<16x128xf32>
    %c6 = arith.constant 6 : index
    %c0_35 = arith.constant 0 : index
    %76 = memref.load %arg2[%c6, %c0_35] : memref<10x2xf32, #tpu.memory_space<smem>>
    %77 = vector.broadcast %76 : f32 to vector<16x128xf32>
    %78 = arith.mulf %77, %1 : vector<16x128xf32>
    %c6_36 = arith.constant 6 : index
    %c1_37 = arith.constant 1 : index
    %79 = memref.load %arg2[%c6_36, %c1_37] : memref<10x2xf32, #tpu.memory_space<smem>>
    %80 = vector.broadcast %79 : f32 to vector<16x128xf32>
    %81 = arith.mulf %80, %3 : vector<16x128xf32>
    %82 = arith.addf %78, %81 : vector<16x128xf32>
    %c6_38 = arith.constant 6 : index
    %83 = memref.load %arg3[%c6_38] : memref<10xf32, #tpu.memory_space<smem>>
    %84 = vector.broadcast %83 : f32 to vector<16x128xf32>
    %85 = arith.addf %82, %84 : vector<16x128xf32>
    %cst_39 = arith.constant 0.000000e+00 : f32
    %86 = vector.broadcast %cst_39 : f32 to vector<16x128xf32>
    %87 = arith.maximumf %85, %86 : vector<16x128xf32>
    %c7 = arith.constant 7 : index
    %c0_40 = arith.constant 0 : index
    %88 = memref.load %arg2[%c7, %c0_40] : memref<10x2xf32, #tpu.memory_space<smem>>
    %89 = vector.broadcast %88 : f32 to vector<16x128xf32>
    %90 = arith.mulf %89, %1 : vector<16x128xf32>
    %c7_41 = arith.constant 7 : index
    %c1_42 = arith.constant 1 : index
    %91 = memref.load %arg2[%c7_41, %c1_42] : memref<10x2xf32, #tpu.memory_space<smem>>
    %92 = vector.broadcast %91 : f32 to vector<16x128xf32>
    %93 = arith.mulf %92, %3 : vector<16x128xf32>
    %94 = arith.addf %90, %93 : vector<16x128xf32>
    %c7_43 = arith.constant 7 : index
    %95 = memref.load %arg3[%c7_43] : memref<10xf32, #tpu.memory_space<smem>>
    %96 = vector.broadcast %95 : f32 to vector<16x128xf32>
    %97 = arith.addf %94, %96 : vector<16x128xf32>
    %cst_44 = arith.constant 0.000000e+00 : f32
    %98 = vector.broadcast %cst_44 : f32 to vector<16x128xf32>
    %99 = arith.maximumf %97, %98 : vector<16x128xf32>
    %c8 = arith.constant 8 : index
    %c0_45 = arith.constant 0 : index
    %100 = memref.load %arg2[%c8, %c0_45] : memref<10x2xf32, #tpu.memory_space<smem>>
    %101 = vector.broadcast %100 : f32 to vector<16x128xf32>
    %102 = arith.mulf %101, %1 : vector<16x128xf32>
    %c8_46 = arith.constant 8 : index
    %c1_47 = arith.constant 1 : index
    %103 = memref.load %arg2[%c8_46, %c1_47] : memref<10x2xf32, #tpu.memory_space<smem>>
    %104 = vector.broadcast %103 : f32 to vector<16x128xf32>
    %105 = arith.mulf %104, %3 : vector<16x128xf32>
    %106 = arith.addf %102, %105 : vector<16x128xf32>
    %c8_48 = arith.constant 8 : index
    %107 = memref.load %arg3[%c8_48] : memref<10xf32, #tpu.memory_space<smem>>
    %108 = vector.broadcast %107 : f32 to vector<16x128xf32>
    %109 = arith.addf %106, %108 : vector<16x128xf32>
    %cst_49 = arith.constant 0.000000e+00 : f32
    %110 = vector.broadcast %cst_49 : f32 to vector<16x128xf32>
    %111 = arith.maximumf %109, %110 : vector<16x128xf32>
    %c9 = arith.constant 9 : index
    %c0_50 = arith.constant 0 : index
    %112 = memref.load %arg2[%c9, %c0_50] : memref<10x2xf32, #tpu.memory_space<smem>>
    %113 = vector.broadcast %112 : f32 to vector<16x128xf32>
    %114 = arith.mulf %113, %1 : vector<16x128xf32>
    %c9_51 = arith.constant 9 : index
    %c1_52 = arith.constant 1 : index
    %115 = memref.load %arg2[%c9_51, %c1_52] : memref<10x2xf32, #tpu.memory_space<smem>>
    %116 = vector.broadcast %115 : f32 to vector<16x128xf32>
    %117 = arith.mulf %116, %3 : vector<16x128xf32>
    %118 = arith.addf %114, %117 : vector<16x128xf32>
    %c9_53 = arith.constant 9 : index
    %119 = memref.load %arg3[%c9_53] : memref<10xf32, #tpu.memory_space<smem>>
    %120 = vector.broadcast %119 : f32 to vector<16x128xf32>
    %121 = arith.addf %118, %120 : vector<16x128xf32>
    %cst_54 = arith.constant 0.000000e+00 : f32
    %122 = vector.broadcast %cst_54 : f32 to vector<16x128xf32>
    %123 = arith.maximumf %121, %122 : vector<16x128xf32>
    %c0_55 = arith.constant 0 : index
    %c0_56 = arith.constant 0 : index
    %124 = memref.load %arg4[%c0_55, %c0_56] : memref<10x10xf32, #tpu.memory_space<smem>>
    %125 = vector.broadcast %124 : f32 to vector<16x128xf32>
    %126 = arith.mulf %125, %15 : vector<16x128xf32>
    %c0_57 = arith.constant 0 : index
    %127 = memref.load %arg5[%c0_57] : memref<10xf32, #tpu.memory_space<smem>>
    %128 = vector.broadcast %127 : f32 to vector<16x128xf32>
    %129 = arith.addf %126, %128 : vector<16x128xf32>
    %c0_58 = arith.constant 0 : index
    %c1_59 = arith.constant 1 : index
    %130 = memref.load %arg4[%c0_58, %c1_59] : memref<10x10xf32, #tpu.memory_space<smem>>
    %131 = vector.broadcast %130 : f32 to vector<16x128xf32>
    %132 = arith.mulf %131, %27 : vector<16x128xf32>
    %c0_60 = arith.constant 0 : index
    %c2_61 = arith.constant 2 : index
    %133 = memref.load %arg4[%c0_60, %c2_61] : memref<10x10xf32, #tpu.memory_space<smem>>
    %134 = vector.broadcast %133 : f32 to vector<16x128xf32>
    %135 = arith.mulf %134, %39 : vector<16x128xf32>
    %136 = arith.addf %129, %135 : vector<16x128xf32>
    %c0_62 = arith.constant 0 : index
    %c3_63 = arith.constant 3 : index
    %137 = memref.load %arg4[%c0_62, %c3_63] : memref<10x10xf32, #tpu.memory_space<smem>>
    %138 = vector.broadcast %137 : f32 to vector<16x128xf32>
    %139 = arith.mulf %138, %51 : vector<16x128xf32>
    %140 = arith.addf %132, %139 : vector<16x128xf32>
    %c0_64 = arith.constant 0 : index
    %c4_65 = arith.constant 4 : index
    %141 = memref.load %arg4[%c0_64, %c4_65] : memref<10x10xf32, #tpu.memory_space<smem>>
    %142 = vector.broadcast %141 : f32 to vector<16x128xf32>
    %143 = arith.mulf %142, %63 : vector<16x128xf32>
    %144 = arith.addf %136, %143 : vector<16x128xf32>
    %c0_66 = arith.constant 0 : index
    %c5_67 = arith.constant 5 : index
    %145 = memref.load %arg4[%c0_66, %c5_67] : memref<10x10xf32, #tpu.memory_space<smem>>
    %146 = vector.broadcast %145 : f32 to vector<16x128xf32>
    %147 = arith.mulf %146, %75 : vector<16x128xf32>
    %148 = arith.addf %140, %147 : vector<16x128xf32>
    %c0_68 = arith.constant 0 : index
    %c6_69 = arith.constant 6 : index
    %149 = memref.load %arg4[%c0_68, %c6_69] : memref<10x10xf32, #tpu.memory_space<smem>>
    %150 = vector.broadcast %149 : f32 to vector<16x128xf32>
    %151 = arith.mulf %150, %87 : vector<16x128xf32>
    %152 = arith.addf %144, %151 : vector<16x128xf32>
    %c0_70 = arith.constant 0 : index
    %c7_71 = arith.constant 7 : index
    %153 = memref.load %arg4[%c0_70, %c7_71] : memref<10x10xf32, #tpu.memory_space<smem>>
    %154 = vector.broadcast %153 : f32 to vector<16x128xf32>
    %155 = arith.mulf %154, %99 : vector<16x128xf32>
    %156 = arith.addf %148, %155 : vector<16x128xf32>
    %c0_72 = arith.constant 0 : index
    %c8_73 = arith.constant 8 : index
    %157 = memref.load %arg4[%c0_72, %c8_73] : memref<10x10xf32, #tpu.memory_space<smem>>
    %158 = vector.broadcast %157 : f32 to vector<16x128xf32>
    %159 = arith.mulf %158, %111 : vector<16x128xf32>
    %160 = arith.addf %152, %159 : vector<16x128xf32>
    %c0_74 = arith.constant 0 : index
    %c9_75 = arith.constant 9 : index
    %161 = memref.load %arg4[%c0_74, %c9_75] : memref<10x10xf32, #tpu.memory_space<smem>>
    %162 = vector.broadcast %161 : f32 to vector<16x128xf32>
    %163 = arith.mulf %162, %123 : vector<16x128xf32>
    %164 = arith.addf %156, %163 : vector<16x128xf32>
    %165 = arith.addf %160, %164 : vector<16x128xf32>
    %cst_76 = arith.constant 0.000000e+00 : f32
    %166 = vector.broadcast %cst_76 : f32 to vector<16x128xf32>
    %167 = arith.maximumf %165, %166 : vector<16x128xf32>
    %c1_77 = arith.constant 1 : index
    %c0_78 = arith.constant 0 : index
    %168 = memref.load %arg4[%c1_77, %c0_78] : memref<10x10xf32, #tpu.memory_space<smem>>
    %169 = vector.broadcast %168 : f32 to vector<16x128xf32>
    %170 = arith.mulf %169, %15 : vector<16x128xf32>
    %c1_79 = arith.constant 1 : index
    %171 = memref.load %arg5[%c1_79] : memref<10xf32, #tpu.memory_space<smem>>
    %172 = vector.broadcast %171 : f32 to vector<16x128xf32>
    %173 = arith.addf %170, %172 : vector<16x128xf32>
    %c1_80 = arith.constant 1 : index
    %c1_81 = arith.constant 1 : index
    %174 = memref.load %arg4[%c1_80, %c1_81] : memref<10x10xf32, #tpu.memory_space<smem>>
    %175 = vector.broadcast %174 : f32 to vector<16x128xf32>
    %176 = arith.mulf %175, %27 : vector<16x128xf32>
    %c1_82 = arith.constant 1 : index
    %c2_83 = arith.constant 2 : index
    %177 = memref.load %arg4[%c1_82, %c2_83] : memref<10x10xf32, #tpu.memory_space<smem>>
    %178 = vector.broadcast %177 : f32 to vector<16x128xf32>
    %179 = arith.mulf %178, %39 : vector<16x128xf32>
    %180 = arith.addf %173, %179 : vector<16x128xf32>
    %c1_84 = arith.constant 1 : index
    %c3_85 = arith.constant 3 : index
    %181 = memref.load %arg4[%c1_84, %c3_85] : memref<10x10xf32, #tpu.memory_space<smem>>
    %182 = vector.broadcast %181 : f32 to vector<16x128xf32>
    %183 = arith.mulf %182, %51 : vector<16x128xf32>
    %184 = arith.addf %176, %183 : vector<16x128xf32>
    %c1_86 = arith.constant 1 : index
    %c4_87 = arith.constant 4 : index
    %185 = memref.load %arg4[%c1_86, %c4_87] : memref<10x10xf32, #tpu.memory_space<smem>>
    %186 = vector.broadcast %185 : f32 to vector<16x128xf32>
    %187 = arith.mulf %186, %63 : vector<16x128xf32>
    %188 = arith.addf %180, %187 : vector<16x128xf32>
    %c1_88 = arith.constant 1 : index
    %c5_89 = arith.constant 5 : index
    %189 = memref.load %arg4[%c1_88, %c5_89] : memref<10x10xf32, #tpu.memory_space<smem>>
    %190 = vector.broadcast %189 : f32 to vector<16x128xf32>
    %191 = arith.mulf %190, %75 : vector<16x128xf32>
    %192 = arith.addf %184, %191 : vector<16x128xf32>
    %c1_90 = arith.constant 1 : index
    %c6_91 = arith.constant 6 : index
    %193 = memref.load %arg4[%c1_90, %c6_91] : memref<10x10xf32, #tpu.memory_space<smem>>
    %194 = vector.broadcast %193 : f32 to vector<16x128xf32>
    %195 = arith.mulf %194, %87 : vector<16x128xf32>
    %196 = arith.addf %188, %195 : vector<16x128xf32>
    %c1_92 = arith.constant 1 : index
    %c7_93 = arith.constant 7 : index
    %197 = memref.load %arg4[%c1_92, %c7_93] : memref<10x10xf32, #tpu.memory_space<smem>>
    %198 = vector.broadcast %197 : f32 to vector<16x128xf32>
    %199 = arith.mulf %198, %99 : vector<16x128xf32>
    %200 = arith.addf %192, %199 : vector<16x128xf32>
    %c1_94 = arith.constant 1 : index
    %c8_95 = arith.constant 8 : index
    %201 = memref.load %arg4[%c1_94, %c8_95] : memref<10x10xf32, #tpu.memory_space<smem>>
    %202 = vector.broadcast %201 : f32 to vector<16x128xf32>
    %203 = arith.mulf %202, %111 : vector<16x128xf32>
    %204 = arith.addf %196, %203 : vector<16x128xf32>
    %c1_96 = arith.constant 1 : index
    %c9_97 = arith.constant 9 : index
    %205 = memref.load %arg4[%c1_96, %c9_97] : memref<10x10xf32, #tpu.memory_space<smem>>
    %206 = vector.broadcast %205 : f32 to vector<16x128xf32>
    %207 = arith.mulf %206, %123 : vector<16x128xf32>
    %208 = arith.addf %200, %207 : vector<16x128xf32>
    %209 = arith.addf %204, %208 : vector<16x128xf32>
    %cst_98 = arith.constant 0.000000e+00 : f32
    %210 = vector.broadcast %cst_98 : f32 to vector<16x128xf32>
    %211 = arith.maximumf %209, %210 : vector<16x128xf32>
    %c2_99 = arith.constant 2 : index
    %c0_100 = arith.constant 0 : index
    %212 = memref.load %arg4[%c2_99, %c0_100] : memref<10x10xf32, #tpu.memory_space<smem>>
    %213 = vector.broadcast %212 : f32 to vector<16x128xf32>
    %214 = arith.mulf %213, %15 : vector<16x128xf32>
    %c2_101 = arith.constant 2 : index
    %215 = memref.load %arg5[%c2_101] : memref<10xf32, #tpu.memory_space<smem>>
    %216 = vector.broadcast %215 : f32 to vector<16x128xf32>
    %217 = arith.addf %214, %216 : vector<16x128xf32>
    %c2_102 = arith.constant 2 : index
    %c1_103 = arith.constant 1 : index
    %218 = memref.load %arg4[%c2_102, %c1_103] : memref<10x10xf32, #tpu.memory_space<smem>>
    %219 = vector.broadcast %218 : f32 to vector<16x128xf32>
    %220 = arith.mulf %219, %27 : vector<16x128xf32>
    %c2_104 = arith.constant 2 : index
    %c2_105 = arith.constant 2 : index
    %221 = memref.load %arg4[%c2_104, %c2_105] : memref<10x10xf32, #tpu.memory_space<smem>>
    %222 = vector.broadcast %221 : f32 to vector<16x128xf32>
    %223 = arith.mulf %222, %39 : vector<16x128xf32>
    %224 = arith.addf %217, %223 : vector<16x128xf32>
    %c2_106 = arith.constant 2 : index
    %c3_107 = arith.constant 3 : index
    %225 = memref.load %arg4[%c2_106, %c3_107] : memref<10x10xf32, #tpu.memory_space<smem>>
    %226 = vector.broadcast %225 : f32 to vector<16x128xf32>
    %227 = arith.mulf %226, %51 : vector<16x128xf32>
    %228 = arith.addf %220, %227 : vector<16x128xf32>
    %c2_108 = arith.constant 2 : index
    %c4_109 = arith.constant 4 : index
    %229 = memref.load %arg4[%c2_108, %c4_109] : memref<10x10xf32, #tpu.memory_space<smem>>
    %230 = vector.broadcast %229 : f32 to vector<16x128xf32>
    %231 = arith.mulf %230, %63 : vector<16x128xf32>
    %232 = arith.addf %224, %231 : vector<16x128xf32>
    %c2_110 = arith.constant 2 : index
    %c5_111 = arith.constant 5 : index
    %233 = memref.load %arg4[%c2_110, %c5_111] : memref<10x10xf32, #tpu.memory_space<smem>>
    %234 = vector.broadcast %233 : f32 to vector<16x128xf32>
    %235 = arith.mulf %234, %75 : vector<16x128xf32>
    %236 = arith.addf %228, %235 : vector<16x128xf32>
    %c2_112 = arith.constant 2 : index
    %c6_113 = arith.constant 6 : index
    %237 = memref.load %arg4[%c2_112, %c6_113] : memref<10x10xf32, #tpu.memory_space<smem>>
    %238 = vector.broadcast %237 : f32 to vector<16x128xf32>
    %239 = arith.mulf %238, %87 : vector<16x128xf32>
    %240 = arith.addf %232, %239 : vector<16x128xf32>
    %c2_114 = arith.constant 2 : index
    %c7_115 = arith.constant 7 : index
    %241 = memref.load %arg4[%c2_114, %c7_115] : memref<10x10xf32, #tpu.memory_space<smem>>
    %242 = vector.broadcast %241 : f32 to vector<16x128xf32>
    %243 = arith.mulf %242, %99 : vector<16x128xf32>
    %244 = arith.addf %236, %243 : vector<16x128xf32>
    %c2_116 = arith.constant 2 : index
    %c8_117 = arith.constant 8 : index
    %245 = memref.load %arg4[%c2_116, %c8_117] : memref<10x10xf32, #tpu.memory_space<smem>>
    %246 = vector.broadcast %245 : f32 to vector<16x128xf32>
    %247 = arith.mulf %246, %111 : vector<16x128xf32>
    %248 = arith.addf %240, %247 : vector<16x128xf32>
    %c2_118 = arith.constant 2 : index
    %c9_119 = arith.constant 9 : index
    %249 = memref.load %arg4[%c2_118, %c9_119] : memref<10x10xf32, #tpu.memory_space<smem>>
    %250 = vector.broadcast %249 : f32 to vector<16x128xf32>
    %251 = arith.mulf %250, %123 : vector<16x128xf32>
    %252 = arith.addf %244, %251 : vector<16x128xf32>
    %253 = arith.addf %248, %252 : vector<16x128xf32>
    %cst_120 = arith.constant 0.000000e+00 : f32
    %254 = vector.broadcast %cst_120 : f32 to vector<16x128xf32>
    %255 = arith.maximumf %253, %254 : vector<16x128xf32>
    %c3_121 = arith.constant 3 : index
    %c0_122 = arith.constant 0 : index
    %256 = memref.load %arg4[%c3_121, %c0_122] : memref<10x10xf32, #tpu.memory_space<smem>>
    %257 = vector.broadcast %256 : f32 to vector<16x128xf32>
    %258 = arith.mulf %257, %15 : vector<16x128xf32>
    %c3_123 = arith.constant 3 : index
    %259 = memref.load %arg5[%c3_123] : memref<10xf32, #tpu.memory_space<smem>>
    %260 = vector.broadcast %259 : f32 to vector<16x128xf32>
    %261 = arith.addf %258, %260 : vector<16x128xf32>
    %c3_124 = arith.constant 3 : index
    %c1_125 = arith.constant 1 : index
    %262 = memref.load %arg4[%c3_124, %c1_125] : memref<10x10xf32, #tpu.memory_space<smem>>
    %263 = vector.broadcast %262 : f32 to vector<16x128xf32>
    %264 = arith.mulf %263, %27 : vector<16x128xf32>
    %c3_126 = arith.constant 3 : index
    %c2_127 = arith.constant 2 : index
    %265 = memref.load %arg4[%c3_126, %c2_127] : memref<10x10xf32, #tpu.memory_space<smem>>
    %266 = vector.broadcast %265 : f32 to vector<16x128xf32>
    %267 = arith.mulf %266, %39 : vector<16x128xf32>
    %268 = arith.addf %261, %267 : vector<16x128xf32>
    %c3_128 = arith.constant 3 : index
    %c3_129 = arith.constant 3 : index
    %269 = memref.load %arg4[%c3_128, %c3_129] : memref<10x10xf32, #tpu.memory_space<smem>>
    %270 = vector.broadcast %269 : f32 to vector<16x128xf32>
    %271 = arith.mulf %270, %51 : vector<16x128xf32>
    %272 = arith.addf %264, %271 : vector<16x128xf32>
    %c3_130 = arith.constant 3 : index
    %c4_131 = arith.constant 4 : index
    %273 = memref.load %arg4[%c3_130, %c4_131] : memref<10x10xf32, #tpu.memory_space<smem>>
    %274 = vector.broadcast %273 : f32 to vector<16x128xf32>
    %275 = arith.mulf %274, %63 : vector<16x128xf32>
    %276 = arith.addf %268, %275 : vector<16x128xf32>
    %c3_132 = arith.constant 3 : index
    %c5_133 = arith.constant 5 : index
    %277 = memref.load %arg4[%c3_132, %c5_133] : memref<10x10xf32, #tpu.memory_space<smem>>
    %278 = vector.broadcast %277 : f32 to vector<16x128xf32>
    %279 = arith.mulf %278, %75 : vector<16x128xf32>
    %280 = arith.addf %272, %279 : vector<16x128xf32>
    %c3_134 = arith.constant 3 : index
    %c6_135 = arith.constant 6 : index
    %281 = memref.load %arg4[%c3_134, %c6_135] : memref<10x10xf32, #tpu.memory_space<smem>>
    %282 = vector.broadcast %281 : f32 to vector<16x128xf32>
    %283 = arith.mulf %282, %87 : vector<16x128xf32>
    %284 = arith.addf %276, %283 : vector<16x128xf32>
    %c3_136 = arith.constant 3 : index
    %c7_137 = arith.constant 7 : index
    %285 = memref.load %arg4[%c3_136, %c7_137] : memref<10x10xf32, #tpu.memory_space<smem>>
    %286 = vector.broadcast %285 : f32 to vector<16x128xf32>
    %287 = arith.mulf %286, %99 : vector<16x128xf32>
    %288 = arith.addf %280, %287 : vector<16x128xf32>
    %c3_138 = arith.constant 3 : index
    %c8_139 = arith.constant 8 : index
    %289 = memref.load %arg4[%c3_138, %c8_139] : memref<10x10xf32, #tpu.memory_space<smem>>
    %290 = vector.broadcast %289 : f32 to vector<16x128xf32>
    %291 = arith.mulf %290, %111 : vector<16x128xf32>
    %292 = arith.addf %284, %291 : vector<16x128xf32>
    %c3_140 = arith.constant 3 : index
    %c9_141 = arith.constant 9 : index
    %293 = memref.load %arg4[%c3_140, %c9_141] : memref<10x10xf32, #tpu.memory_space<smem>>
    %294 = vector.broadcast %293 : f32 to vector<16x128xf32>
    %295 = arith.mulf %294, %123 : vector<16x128xf32>
    %296 = arith.addf %288, %295 : vector<16x128xf32>
    %297 = arith.addf %292, %296 : vector<16x128xf32>
    %cst_142 = arith.constant 0.000000e+00 : f32
    %298 = vector.broadcast %cst_142 : f32 to vector<16x128xf32>
    %299 = arith.maximumf %297, %298 : vector<16x128xf32>
    %c4_143 = arith.constant 4 : index
    %c0_144 = arith.constant 0 : index
    %300 = memref.load %arg4[%c4_143, %c0_144] : memref<10x10xf32, #tpu.memory_space<smem>>
    %301 = vector.broadcast %300 : f32 to vector<16x128xf32>
    %302 = arith.mulf %301, %15 : vector<16x128xf32>
    %c4_145 = arith.constant 4 : index
    %303 = memref.load %arg5[%c4_145] : memref<10xf32, #tpu.memory_space<smem>>
    %304 = vector.broadcast %303 : f32 to vector<16x128xf32>
    %305 = arith.addf %302, %304 : vector<16x128xf32>
    %c4_146 = arith.constant 4 : index
    %c1_147 = arith.constant 1 : index
    %306 = memref.load %arg4[%c4_146, %c1_147] : memref<10x10xf32, #tpu.memory_space<smem>>
    %307 = vector.broadcast %306 : f32 to vector<16x128xf32>
    %308 = arith.mulf %307, %27 : vector<16x128xf32>
    %c4_148 = arith.constant 4 : index
    %c2_149 = arith.constant 2 : index
    %309 = memref.load %arg4[%c4_148, %c2_149] : memref<10x10xf32, #tpu.memory_space<smem>>
    %310 = vector.broadcast %309 : f32 to vector<16x128xf32>
    %311 = arith.mulf %310, %39 : vector<16x128xf32>
    %312 = arith.addf %305, %311 : vector<16x128xf32>
    %c4_150 = arith.constant 4 : index
    %c3_151 = arith.constant 3 : index
    %313 = memref.load %arg4[%c4_150, %c3_151] : memref<10x10xf32, #tpu.memory_space<smem>>
    %314 = vector.broadcast %313 : f32 to vector<16x128xf32>
    %315 = arith.mulf %314, %51 : vector<16x128xf32>
    %316 = arith.addf %308, %315 : vector<16x128xf32>
    %c4_152 = arith.constant 4 : index
    %c4_153 = arith.constant 4 : index
    %317 = memref.load %arg4[%c4_152, %c4_153] : memref<10x10xf32, #tpu.memory_space<smem>>
    %318 = vector.broadcast %317 : f32 to vector<16x128xf32>
    %319 = arith.mulf %318, %63 : vector<16x128xf32>
    %320 = arith.addf %312, %319 : vector<16x128xf32>
    %c4_154 = arith.constant 4 : index
    %c5_155 = arith.constant 5 : index
    %321 = memref.load %arg4[%c4_154, %c5_155] : memref<10x10xf32, #tpu.memory_space<smem>>
    %322 = vector.broadcast %321 : f32 to vector<16x128xf32>
    %323 = arith.mulf %322, %75 : vector<16x128xf32>
    %324 = arith.addf %316, %323 : vector<16x128xf32>
    %c4_156 = arith.constant 4 : index
    %c6_157 = arith.constant 6 : index
    %325 = memref.load %arg4[%c4_156, %c6_157] : memref<10x10xf32, #tpu.memory_space<smem>>
    %326 = vector.broadcast %325 : f32 to vector<16x128xf32>
    %327 = arith.mulf %326, %87 : vector<16x128xf32>
    %328 = arith.addf %320, %327 : vector<16x128xf32>
    %c4_158 = arith.constant 4 : index
    %c7_159 = arith.constant 7 : index
    %329 = memref.load %arg4[%c4_158, %c7_159] : memref<10x10xf32, #tpu.memory_space<smem>>
    %330 = vector.broadcast %329 : f32 to vector<16x128xf32>
    %331 = arith.mulf %330, %99 : vector<16x128xf32>
    %332 = arith.addf %324, %331 : vector<16x128xf32>
    %c4_160 = arith.constant 4 : index
    %c8_161 = arith.constant 8 : index
    %333 = memref.load %arg4[%c4_160, %c8_161] : memref<10x10xf32, #tpu.memory_space<smem>>
    %334 = vector.broadcast %333 : f32 to vector<16x128xf32>
    %335 = arith.mulf %334, %111 : vector<16x128xf32>
    %336 = arith.addf %328, %335 : vector<16x128xf32>
    %c4_162 = arith.constant 4 : index
    %c9_163 = arith.constant 9 : index
    %337 = memref.load %arg4[%c4_162, %c9_163] : memref<10x10xf32, #tpu.memory_space<smem>>
    %338 = vector.broadcast %337 : f32 to vector<16x128xf32>
    %339 = arith.mulf %338, %123 : vector<16x128xf32>
    %340 = arith.addf %332, %339 : vector<16x128xf32>
    %341 = arith.addf %336, %340 : vector<16x128xf32>
    %cst_164 = arith.constant 0.000000e+00 : f32
    %342 = vector.broadcast %cst_164 : f32 to vector<16x128xf32>
    %343 = arith.maximumf %341, %342 : vector<16x128xf32>
    %c5_165 = arith.constant 5 : index
    %c0_166 = arith.constant 0 : index
    %344 = memref.load %arg4[%c5_165, %c0_166] : memref<10x10xf32, #tpu.memory_space<smem>>
    %345 = vector.broadcast %344 : f32 to vector<16x128xf32>
    %346 = arith.mulf %345, %15 : vector<16x128xf32>
    %c5_167 = arith.constant 5 : index
    %347 = memref.load %arg5[%c5_167] : memref<10xf32, #tpu.memory_space<smem>>
    %348 = vector.broadcast %347 : f32 to vector<16x128xf32>
    %349 = arith.addf %346, %348 : vector<16x128xf32>
    %c5_168 = arith.constant 5 : index
    %c1_169 = arith.constant 1 : index
    %350 = memref.load %arg4[%c5_168, %c1_169] : memref<10x10xf32, #tpu.memory_space<smem>>
    %351 = vector.broadcast %350 : f32 to vector<16x128xf32>
    %352 = arith.mulf %351, %27 : vector<16x128xf32>
    %c5_170 = arith.constant 5 : index
    %c2_171 = arith.constant 2 : index
    %353 = memref.load %arg4[%c5_170, %c2_171] : memref<10x10xf32, #tpu.memory_space<smem>>
    %354 = vector.broadcast %353 : f32 to vector<16x128xf32>
    %355 = arith.mulf %354, %39 : vector<16x128xf32>
    %356 = arith.addf %349, %355 : vector<16x128xf32>
    %c5_172 = arith.constant 5 : index
    %c3_173 = arith.constant 3 : index
    %357 = memref.load %arg4[%c5_172, %c3_173] : memref<10x10xf32, #tpu.memory_space<smem>>
    %358 = vector.broadcast %357 : f32 to vector<16x128xf32>
    %359 = arith.mulf %358, %51 : vector<16x128xf32>
    %360 = arith.addf %352, %359 : vector<16x128xf32>
    %c5_174 = arith.constant 5 : index
    %c4_175 = arith.constant 4 : index
    %361 = memref.load %arg4[%c5_174, %c4_175] : memref<10x10xf32, #tpu.memory_space<smem>>
    %362 = vector.broadcast %361 : f32 to vector<16x128xf32>
    %363 = arith.mulf %362, %63 : vector<16x128xf32>
    %364 = arith.addf %356, %363 : vector<16x128xf32>
    %c5_176 = arith.constant 5 : index
    %c5_177 = arith.constant 5 : index
    %365 = memref.load %arg4[%c5_176, %c5_177] : memref<10x10xf32, #tpu.memory_space<smem>>
    %366 = vector.broadcast %365 : f32 to vector<16x128xf32>
    %367 = arith.mulf %366, %75 : vector<16x128xf32>
    %368 = arith.addf %360, %367 : vector<16x128xf32>
    %c5_178 = arith.constant 5 : index
    %c6_179 = arith.constant 6 : index
    %369 = memref.load %arg4[%c5_178, %c6_179] : memref<10x10xf32, #tpu.memory_space<smem>>
    %370 = vector.broadcast %369 : f32 to vector<16x128xf32>
    %371 = arith.mulf %370, %87 : vector<16x128xf32>
    %372 = arith.addf %364, %371 : vector<16x128xf32>
    %c5_180 = arith.constant 5 : index
    %c7_181 = arith.constant 7 : index
    %373 = memref.load %arg4[%c5_180, %c7_181] : memref<10x10xf32, #tpu.memory_space<smem>>
    %374 = vector.broadcast %373 : f32 to vector<16x128xf32>
    %375 = arith.mulf %374, %99 : vector<16x128xf32>
    %376 = arith.addf %368, %375 : vector<16x128xf32>
    %c5_182 = arith.constant 5 : index
    %c8_183 = arith.constant 8 : index
    %377 = memref.load %arg4[%c5_182, %c8_183] : memref<10x10xf32, #tpu.memory_space<smem>>
    %378 = vector.broadcast %377 : f32 to vector<16x128xf32>
    %379 = arith.mulf %378, %111 : vector<16x128xf32>
    %380 = arith.addf %372, %379 : vector<16x128xf32>
    %c5_184 = arith.constant 5 : index
    %c9_185 = arith.constant 9 : index
    %381 = memref.load %arg4[%c5_184, %c9_185] : memref<10x10xf32, #tpu.memory_space<smem>>
    %382 = vector.broadcast %381 : f32 to vector<16x128xf32>
    %383 = arith.mulf %382, %123 : vector<16x128xf32>
    %384 = arith.addf %376, %383 : vector<16x128xf32>
    %385 = arith.addf %380, %384 : vector<16x128xf32>
    %cst_186 = arith.constant 0.000000e+00 : f32
    %386 = vector.broadcast %cst_186 : f32 to vector<16x128xf32>
    %387 = arith.maximumf %385, %386 : vector<16x128xf32>
    %c6_187 = arith.constant 6 : index
    %c0_188 = arith.constant 0 : index
    %388 = memref.load %arg4[%c6_187, %c0_188] : memref<10x10xf32, #tpu.memory_space<smem>>
    %389 = vector.broadcast %388 : f32 to vector<16x128xf32>
    %390 = arith.mulf %389, %15 : vector<16x128xf32>
    %c6_189 = arith.constant 6 : index
    %391 = memref.load %arg5[%c6_189] : memref<10xf32, #tpu.memory_space<smem>>
    %392 = vector.broadcast %391 : f32 to vector<16x128xf32>
    %393 = arith.addf %390, %392 : vector<16x128xf32>
    %c6_190 = arith.constant 6 : index
    %c1_191 = arith.constant 1 : index
    %394 = memref.load %arg4[%c6_190, %c1_191] : memref<10x10xf32, #tpu.memory_space<smem>>
    %395 = vector.broadcast %394 : f32 to vector<16x128xf32>
    %396 = arith.mulf %395, %27 : vector<16x128xf32>
    %c6_192 = arith.constant 6 : index
    %c2_193 = arith.constant 2 : index
    %397 = memref.load %arg4[%c6_192, %c2_193] : memref<10x10xf32, #tpu.memory_space<smem>>
    %398 = vector.broadcast %397 : f32 to vector<16x128xf32>
    %399 = arith.mulf %398, %39 : vector<16x128xf32>
    %400 = arith.addf %393, %399 : vector<16x128xf32>
    %c6_194 = arith.constant 6 : index
    %c3_195 = arith.constant 3 : index
    %401 = memref.load %arg4[%c6_194, %c3_195] : memref<10x10xf32, #tpu.memory_space<smem>>
    %402 = vector.broadcast %401 : f32 to vector<16x128xf32>
    %403 = arith.mulf %402, %51 : vector<16x128xf32>
    %404 = arith.addf %396, %403 : vector<16x128xf32>
    %c6_196 = arith.constant 6 : index
    %c4_197 = arith.constant 4 : index
    %405 = memref.load %arg4[%c6_196, %c4_197] : memref<10x10xf32, #tpu.memory_space<smem>>
    %406 = vector.broadcast %405 : f32 to vector<16x128xf32>
    %407 = arith.mulf %406, %63 : vector<16x128xf32>
    %408 = arith.addf %400, %407 : vector<16x128xf32>
    %c6_198 = arith.constant 6 : index
    %c5_199 = arith.constant 5 : index
    %409 = memref.load %arg4[%c6_198, %c5_199] : memref<10x10xf32, #tpu.memory_space<smem>>
    %410 = vector.broadcast %409 : f32 to vector<16x128xf32>
    %411 = arith.mulf %410, %75 : vector<16x128xf32>
    %412 = arith.addf %404, %411 : vector<16x128xf32>
    %c6_200 = arith.constant 6 : index
    %c6_201 = arith.constant 6 : index
    %413 = memref.load %arg4[%c6_200, %c6_201] : memref<10x10xf32, #tpu.memory_space<smem>>
    %414 = vector.broadcast %413 : f32 to vector<16x128xf32>
    %415 = arith.mulf %414, %87 : vector<16x128xf32>
    %416 = arith.addf %408, %415 : vector<16x128xf32>
    %c6_202 = arith.constant 6 : index
    %c7_203 = arith.constant 7 : index
    %417 = memref.load %arg4[%c6_202, %c7_203] : memref<10x10xf32, #tpu.memory_space<smem>>
    %418 = vector.broadcast %417 : f32 to vector<16x128xf32>
    %419 = arith.mulf %418, %99 : vector<16x128xf32>
    %420 = arith.addf %412, %419 : vector<16x128xf32>
    %c6_204 = arith.constant 6 : index
    %c8_205 = arith.constant 8 : index
    %421 = memref.load %arg4[%c6_204, %c8_205] : memref<10x10xf32, #tpu.memory_space<smem>>
    %422 = vector.broadcast %421 : f32 to vector<16x128xf32>
    %423 = arith.mulf %422, %111 : vector<16x128xf32>
    %424 = arith.addf %416, %423 : vector<16x128xf32>
    %c6_206 = arith.constant 6 : index
    %c9_207 = arith.constant 9 : index
    %425 = memref.load %arg4[%c6_206, %c9_207] : memref<10x10xf32, #tpu.memory_space<smem>>
    %426 = vector.broadcast %425 : f32 to vector<16x128xf32>
    %427 = arith.mulf %426, %123 : vector<16x128xf32>
    %428 = arith.addf %420, %427 : vector<16x128xf32>
    %429 = arith.addf %424, %428 : vector<16x128xf32>
    %cst_208 = arith.constant 0.000000e+00 : f32
    %430 = vector.broadcast %cst_208 : f32 to vector<16x128xf32>
    %431 = arith.maximumf %429, %430 : vector<16x128xf32>
    %c7_209 = arith.constant 7 : index
    %c0_210 = arith.constant 0 : index
    %432 = memref.load %arg4[%c7_209, %c0_210] : memref<10x10xf32, #tpu.memory_space<smem>>
    %433 = vector.broadcast %432 : f32 to vector<16x128xf32>
    %434 = arith.mulf %433, %15 : vector<16x128xf32>
    %c7_211 = arith.constant 7 : index
    %435 = memref.load %arg5[%c7_211] : memref<10xf32, #tpu.memory_space<smem>>
    %436 = vector.broadcast %435 : f32 to vector<16x128xf32>
    %437 = arith.addf %434, %436 : vector<16x128xf32>
    %c7_212 = arith.constant 7 : index
    %c1_213 = arith.constant 1 : index
    %438 = memref.load %arg4[%c7_212, %c1_213] : memref<10x10xf32, #tpu.memory_space<smem>>
    %439 = vector.broadcast %438 : f32 to vector<16x128xf32>
    %440 = arith.mulf %439, %27 : vector<16x128xf32>
    %c7_214 = arith.constant 7 : index
    %c2_215 = arith.constant 2 : index
    %441 = memref.load %arg4[%c7_214, %c2_215] : memref<10x10xf32, #tpu.memory_space<smem>>
    %442 = vector.broadcast %441 : f32 to vector<16x128xf32>
    %443 = arith.mulf %442, %39 : vector<16x128xf32>
    %444 = arith.addf %437, %443 : vector<16x128xf32>
    %c7_216 = arith.constant 7 : index
    %c3_217 = arith.constant 3 : index
    %445 = memref.load %arg4[%c7_216, %c3_217] : memref<10x10xf32, #tpu.memory_space<smem>>
    %446 = vector.broadcast %445 : f32 to vector<16x128xf32>
    %447 = arith.mulf %446, %51 : vector<16x128xf32>
    %448 = arith.addf %440, %447 : vector<16x128xf32>
    %c7_218 = arith.constant 7 : index
    %c4_219 = arith.constant 4 : index
    %449 = memref.load %arg4[%c7_218, %c4_219] : memref<10x10xf32, #tpu.memory_space<smem>>
    %450 = vector.broadcast %449 : f32 to vector<16x128xf32>
    %451 = arith.mulf %450, %63 : vector<16x128xf32>
    %452 = arith.addf %444, %451 : vector<16x128xf32>
    %c7_220 = arith.constant 7 : index
    %c5_221 = arith.constant 5 : index
    %453 = memref.load %arg4[%c7_220, %c5_221] : memref<10x10xf32, #tpu.memory_space<smem>>
    %454 = vector.broadcast %453 : f32 to vector<16x128xf32>
    %455 = arith.mulf %454, %75 : vector<16x128xf32>
    %456 = arith.addf %448, %455 : vector<16x128xf32>
    %c7_222 = arith.constant 7 : index
    %c6_223 = arith.constant 6 : index
    %457 = memref.load %arg4[%c7_222, %c6_223] : memref<10x10xf32, #tpu.memory_space<smem>>
    %458 = vector.broadcast %457 : f32 to vector<16x128xf32>
    %459 = arith.mulf %458, %87 : vector<16x128xf32>
    %460 = arith.addf %452, %459 : vector<16x128xf32>
    %c7_224 = arith.constant 7 : index
    %c7_225 = arith.constant 7 : index
    %461 = memref.load %arg4[%c7_224, %c7_225] : memref<10x10xf32, #tpu.memory_space<smem>>
    %462 = vector.broadcast %461 : f32 to vector<16x128xf32>
    %463 = arith.mulf %462, %99 : vector<16x128xf32>
    %464 = arith.addf %456, %463 : vector<16x128xf32>
    %c7_226 = arith.constant 7 : index
    %c8_227 = arith.constant 8 : index
    %465 = memref.load %arg4[%c7_226, %c8_227] : memref<10x10xf32, #tpu.memory_space<smem>>
    %466 = vector.broadcast %465 : f32 to vector<16x128xf32>
    %467 = arith.mulf %466, %111 : vector<16x128xf32>
    %468 = arith.addf %460, %467 : vector<16x128xf32>
    %c7_228 = arith.constant 7 : index
    %c9_229 = arith.constant 9 : index
    %469 = memref.load %arg4[%c7_228, %c9_229] : memref<10x10xf32, #tpu.memory_space<smem>>
    %470 = vector.broadcast %469 : f32 to vector<16x128xf32>
    %471 = arith.mulf %470, %123 : vector<16x128xf32>
    %472 = arith.addf %464, %471 : vector<16x128xf32>
    %473 = arith.addf %468, %472 : vector<16x128xf32>
    %cst_230 = arith.constant 0.000000e+00 : f32
    %474 = vector.broadcast %cst_230 : f32 to vector<16x128xf32>
    %475 = arith.maximumf %473, %474 : vector<16x128xf32>
    %c8_231 = arith.constant 8 : index
    %c0_232 = arith.constant 0 : index
    %476 = memref.load %arg4[%c8_231, %c0_232] : memref<10x10xf32, #tpu.memory_space<smem>>
    %477 = vector.broadcast %476 : f32 to vector<16x128xf32>
    %478 = arith.mulf %477, %15 : vector<16x128xf32>
    %c8_233 = arith.constant 8 : index
    %479 = memref.load %arg5[%c8_233] : memref<10xf32, #tpu.memory_space<smem>>
    %480 = vector.broadcast %479 : f32 to vector<16x128xf32>
    %481 = arith.addf %478, %480 : vector<16x128xf32>
    %c8_234 = arith.constant 8 : index
    %c1_235 = arith.constant 1 : index
    %482 = memref.load %arg4[%c8_234, %c1_235] : memref<10x10xf32, #tpu.memory_space<smem>>
    %483 = vector.broadcast %482 : f32 to vector<16x128xf32>
    %484 = arith.mulf %483, %27 : vector<16x128xf32>
    %c8_236 = arith.constant 8 : index
    %c2_237 = arith.constant 2 : index
    %485 = memref.load %arg4[%c8_236, %c2_237] : memref<10x10xf32, #tpu.memory_space<smem>>
    %486 = vector.broadcast %485 : f32 to vector<16x128xf32>
    %487 = arith.mulf %486, %39 : vector<16x128xf32>
    %488 = arith.addf %481, %487 : vector<16x128xf32>
    %c8_238 = arith.constant 8 : index
    %c3_239 = arith.constant 3 : index
    %489 = memref.load %arg4[%c8_238, %c3_239] : memref<10x10xf32, #tpu.memory_space<smem>>
    %490 = vector.broadcast %489 : f32 to vector<16x128xf32>
    %491 = arith.mulf %490, %51 : vector<16x128xf32>
    %492 = arith.addf %484, %491 : vector<16x128xf32>
    %c8_240 = arith.constant 8 : index
    %c4_241 = arith.constant 4 : index
    %493 = memref.load %arg4[%c8_240, %c4_241] : memref<10x10xf32, #tpu.memory_space<smem>>
    %494 = vector.broadcast %493 : f32 to vector<16x128xf32>
    %495 = arith.mulf %494, %63 : vector<16x128xf32>
    %496 = arith.addf %488, %495 : vector<16x128xf32>
    %c8_242 = arith.constant 8 : index
    %c5_243 = arith.constant 5 : index
    %497 = memref.load %arg4[%c8_242, %c5_243] : memref<10x10xf32, #tpu.memory_space<smem>>
    %498 = vector.broadcast %497 : f32 to vector<16x128xf32>
    %499 = arith.mulf %498, %75 : vector<16x128xf32>
    %500 = arith.addf %492, %499 : vector<16x128xf32>
    %c8_244 = arith.constant 8 : index
    %c6_245 = arith.constant 6 : index
    %501 = memref.load %arg4[%c8_244, %c6_245] : memref<10x10xf32, #tpu.memory_space<smem>>
    %502 = vector.broadcast %501 : f32 to vector<16x128xf32>
    %503 = arith.mulf %502, %87 : vector<16x128xf32>
    %504 = arith.addf %496, %503 : vector<16x128xf32>
    %c8_246 = arith.constant 8 : index
    %c7_247 = arith.constant 7 : index
    %505 = memref.load %arg4[%c8_246, %c7_247] : memref<10x10xf32, #tpu.memory_space<smem>>
    %506 = vector.broadcast %505 : f32 to vector<16x128xf32>
    %507 = arith.mulf %506, %99 : vector<16x128xf32>
    %508 = arith.addf %500, %507 : vector<16x128xf32>
    %c8_248 = arith.constant 8 : index
    %c8_249 = arith.constant 8 : index
    %509 = memref.load %arg4[%c8_248, %c8_249] : memref<10x10xf32, #tpu.memory_space<smem>>
    %510 = vector.broadcast %509 : f32 to vector<16x128xf32>
    %511 = arith.mulf %510, %111 : vector<16x128xf32>
    %512 = arith.addf %504, %511 : vector<16x128xf32>
    %c8_250 = arith.constant 8 : index
    %c9_251 = arith.constant 9 : index
    %513 = memref.load %arg4[%c8_250, %c9_251] : memref<10x10xf32, #tpu.memory_space<smem>>
    %514 = vector.broadcast %513 : f32 to vector<16x128xf32>
    %515 = arith.mulf %514, %123 : vector<16x128xf32>
    %516 = arith.addf %508, %515 : vector<16x128xf32>
    %517 = arith.addf %512, %516 : vector<16x128xf32>
    %cst_252 = arith.constant 0.000000e+00 : f32
    %518 = vector.broadcast %cst_252 : f32 to vector<16x128xf32>
    %519 = arith.maximumf %517, %518 : vector<16x128xf32>
    %c9_253 = arith.constant 9 : index
    %c0_254 = arith.constant 0 : index
    %520 = memref.load %arg4[%c9_253, %c0_254] : memref<10x10xf32, #tpu.memory_space<smem>>
    %521 = vector.broadcast %520 : f32 to vector<16x128xf32>
    %522 = arith.mulf %521, %15 : vector<16x128xf32>
    %c9_255 = arith.constant 9 : index
    %523 = memref.load %arg5[%c9_255] : memref<10xf32, #tpu.memory_space<smem>>
    %524 = vector.broadcast %523 : f32 to vector<16x128xf32>
    %525 = arith.addf %522, %524 : vector<16x128xf32>
    %c9_256 = arith.constant 9 : index
    %c1_257 = arith.constant 1 : index
    %526 = memref.load %arg4[%c9_256, %c1_257] : memref<10x10xf32, #tpu.memory_space<smem>>
    %527 = vector.broadcast %526 : f32 to vector<16x128xf32>
    %528 = arith.mulf %527, %27 : vector<16x128xf32>
    %c9_258 = arith.constant 9 : index
    %c2_259 = arith.constant 2 : index
    %529 = memref.load %arg4[%c9_258, %c2_259] : memref<10x10xf32, #tpu.memory_space<smem>>
    %530 = vector.broadcast %529 : f32 to vector<16x128xf32>
    %531 = arith.mulf %530, %39 : vector<16x128xf32>
    %532 = arith.addf %525, %531 : vector<16x128xf32>
    %c9_260 = arith.constant 9 : index
    %c3_261 = arith.constant 3 : index
    %533 = memref.load %arg4[%c9_260, %c3_261] : memref<10x10xf32, #tpu.memory_space<smem>>
    %534 = vector.broadcast %533 : f32 to vector<16x128xf32>
    %535 = arith.mulf %534, %51 : vector<16x128xf32>
    %536 = arith.addf %528, %535 : vector<16x128xf32>
    %c9_262 = arith.constant 9 : index
    %c4_263 = arith.constant 4 : index
    %537 = memref.load %arg4[%c9_262, %c4_263] : memref<10x10xf32, #tpu.memory_space<smem>>
    %538 = vector.broadcast %537 : f32 to vector<16x128xf32>
    %539 = arith.mulf %538, %63 : vector<16x128xf32>
    %540 = arith.addf %532, %539 : vector<16x128xf32>
    %c9_264 = arith.constant 9 : index
    %c5_265 = arith.constant 5 : index
    %541 = memref.load %arg4[%c9_264, %c5_265] : memref<10x10xf32, #tpu.memory_space<smem>>
    %542 = vector.broadcast %541 : f32 to vector<16x128xf32>
    %543 = arith.mulf %542, %75 : vector<16x128xf32>
    %544 = arith.addf %536, %543 : vector<16x128xf32>
    %c9_266 = arith.constant 9 : index
    %c6_267 = arith.constant 6 : index
    %545 = memref.load %arg4[%c9_266, %c6_267] : memref<10x10xf32, #tpu.memory_space<smem>>
    %546 = vector.broadcast %545 : f32 to vector<16x128xf32>
    %547 = arith.mulf %546, %87 : vector<16x128xf32>
    %548 = arith.addf %540, %547 : vector<16x128xf32>
    %c9_268 = arith.constant 9 : index
    %c7_269 = arith.constant 7 : index
    %549 = memref.load %arg4[%c9_268, %c7_269] : memref<10x10xf32, #tpu.memory_space<smem>>
    %550 = vector.broadcast %549 : f32 to vector<16x128xf32>
    %551 = arith.mulf %550, %99 : vector<16x128xf32>
    %552 = arith.addf %544, %551 : vector<16x128xf32>
    %c9_270 = arith.constant 9 : index
    %c8_271 = arith.constant 8 : index
    %553 = memref.load %arg4[%c9_270, %c8_271] : memref<10x10xf32, #tpu.memory_space<smem>>
    %554 = vector.broadcast %553 : f32 to vector<16x128xf32>
    %555 = arith.mulf %554, %111 : vector<16x128xf32>
    %556 = arith.addf %548, %555 : vector<16x128xf32>
    %c9_272 = arith.constant 9 : index
    %c9_273 = arith.constant 9 : index
    %557 = memref.load %arg4[%c9_272, %c9_273] : memref<10x10xf32, #tpu.memory_space<smem>>
    %558 = vector.broadcast %557 : f32 to vector<16x128xf32>
    %559 = arith.mulf %558, %123 : vector<16x128xf32>
    %560 = arith.addf %552, %559 : vector<16x128xf32>
    %561 = arith.addf %556, %560 : vector<16x128xf32>
    %cst_274 = arith.constant 0.000000e+00 : f32
    %562 = vector.broadcast %cst_274 : f32 to vector<16x128xf32>
    %563 = arith.maximumf %561, %562 : vector<16x128xf32>
    %c0_275 = arith.constant 0 : index
    %564 = memref.load %arg6[%c0_275] : memref<10xf32, #tpu.memory_space<smem>>
    %565 = vector.broadcast %564 : f32 to vector<16x128xf32>
    %566 = arith.mulf %565, %167 : vector<16x128xf32>
    %c0_276 = arith.constant 0 : index
    %567 = memref.load %arg7[%c0_276] : memref<1xf32, #tpu.memory_space<smem>>
    %568 = vector.broadcast %567 : f32 to vector<16x128xf32>
    %569 = arith.addf %566, %568 : vector<16x128xf32>
    %c1_277 = arith.constant 1 : index
    %570 = memref.load %arg6[%c1_277] : memref<10xf32, #tpu.memory_space<smem>>
    %571 = vector.broadcast %570 : f32 to vector<16x128xf32>
    %572 = arith.mulf %571, %211 : vector<16x128xf32>
    %c2_278 = arith.constant 2 : index
    %573 = memref.load %arg6[%c2_278] : memref<10xf32, #tpu.memory_space<smem>>
    %574 = vector.broadcast %573 : f32 to vector<16x128xf32>
    %575 = arith.mulf %574, %255 : vector<16x128xf32>
    %576 = arith.addf %569, %575 : vector<16x128xf32>
    %c3_279 = arith.constant 3 : index
    %577 = memref.load %arg6[%c3_279] : memref<10xf32, #tpu.memory_space<smem>>
    %578 = vector.broadcast %577 : f32 to vector<16x128xf32>
    %579 = arith.mulf %578, %299 : vector<16x128xf32>
    %580 = arith.addf %572, %579 : vector<16x128xf32>
    %c4_280 = arith.constant 4 : index
    %581 = memref.load %arg6[%c4_280] : memref<10xf32, #tpu.memory_space<smem>>
    %582 = vector.broadcast %581 : f32 to vector<16x128xf32>
    %583 = arith.mulf %582, %343 : vector<16x128xf32>
    %584 = arith.addf %576, %583 : vector<16x128xf32>
    %c5_281 = arith.constant 5 : index
    %585 = memref.load %arg6[%c5_281] : memref<10xf32, #tpu.memory_space<smem>>
    %586 = vector.broadcast %585 : f32 to vector<16x128xf32>
    %587 = arith.mulf %586, %387 : vector<16x128xf32>
    %588 = arith.addf %580, %587 : vector<16x128xf32>
    %c6_282 = arith.constant 6 : index
    %589 = memref.load %arg6[%c6_282] : memref<10xf32, #tpu.memory_space<smem>>
    %590 = vector.broadcast %589 : f32 to vector<16x128xf32>
    %591 = arith.mulf %590, %431 : vector<16x128xf32>
    %592 = arith.addf %584, %591 : vector<16x128xf32>
    %c7_283 = arith.constant 7 : index
    %593 = memref.load %arg6[%c7_283] : memref<10xf32, #tpu.memory_space<smem>>
    %594 = vector.broadcast %593 : f32 to vector<16x128xf32>
    %595 = arith.mulf %594, %475 : vector<16x128xf32>
    %596 = arith.addf %588, %595 : vector<16x128xf32>
    %c8_284 = arith.constant 8 : index
    %597 = memref.load %arg6[%c8_284] : memref<10xf32, #tpu.memory_space<smem>>
    %598 = vector.broadcast %597 : f32 to vector<16x128xf32>
    %599 = arith.mulf %598, %519 : vector<16x128xf32>
    %600 = arith.addf %592, %599 : vector<16x128xf32>
    %c9_285 = arith.constant 9 : index
    %601 = memref.load %arg6[%c9_285] : memref<10xf32, #tpu.memory_space<smem>>
    %602 = vector.broadcast %601 : f32 to vector<16x128xf32>
    %603 = arith.mulf %602, %563 : vector<16x128xf32>
    %604 = arith.addf %596, %603 : vector<16x128xf32>
    %605 = arith.addf %600, %604 : vector<16x128xf32>
    %c0_286 = arith.constant 0 : index
    %c0_287 = arith.constant 0 : index
    %606 = vector.load %arg8[%c0_286, %c0_287] : memref<16x128xf32, #tpu.memory_space<vmem>>, vector<16x128xf32>
    tpu.vector_store %arg8[%c0_286, %c0_287], %605 {strides = array<i32>} : memref<16x128xf32, #tpu.memory_space<vmem>>, vector<16x128xf32>,
    return
  }
  func.func @transform_0(%arg0: i32) -> (i32, i32, i32) {
    %c0_i32 = arith.constant 0 : i32
    %c0_i32_0 = arith.constant 0 : i32
    %c0_i32_1 = arith.constant 0 : i32
    return %c0_i32, %arg0, %c0_i32_0 : i32, i32, i32
  }
  func.func @transform_1(%arg0: i32) -> (i32, i32) {
    %c0_i32 = arith.constant 0 : i32
    %c0_i32_0 = arith.constant 0 : i32
    %c0_i32_1 = arith.constant 0 : i32
    return %c0_i32, %c0_i32_0 : i32, i32
  }
  func.func @transform_2(%arg0: i32) -> i32 {
    %c0_i32 = arith.constant 0 : i32
    %c0_i32_0 = arith.constant 0 : i32
    return %c0_i32 : i32
  }
  func.func @transform_3(%arg0: i32) -> (i32, i32) {
    %c0_i32 = arith.constant 0 : i32
    %c0_i32_0 = arith.constant 0 : i32
    %c0_i32_1 = arith.constant 0 : i32
    return %c0_i32, %c0_i32_0 : i32, i32
  }
  func.func @transform_4(%arg0: i32) -> i32 {
    %c0_i32 = arith.constant 0 : i32
    %c0_i32_0 = arith.constant 0 : i32
    return %c0_i32 : i32
  }
  func.func @transform_5(%arg0: i32) -> i32 {
    %c0_i32 = arith.constant 0 : i32
    %c0_i32_0 = arith.constant 0 : i32
    return %c0_i32 : i32
  }
  func.func @transform_6(%arg0: i32) -> i32 {
    %c0_i32 = arith.constant 0 : i32
    %c0_i32_0 = arith.constant 0 : i32
    return %c0_i32 : i32
  }
  func.func @transform_7(%arg0: i32) -> (i32, i32) {
    %c0_i32 = arith.constant 0 : i32
    %c0_i32_0 = arith.constant 0 : i32
    return %arg0, %c0_i32 : i32, i32
  }
}

</mosaic_0001>

<bundles_post_ra>
// kernel: tpu_custom_call.1
= control target key start
LH: loop header
LB: loop body
LE: loop exit
PB: predicated region body
PF: predicated region fallthrough
CT: control target
= control target key end

     0   :  { %s2931_s0 = inlined_call_operand.hbm [shape: f32[2,48,128], index: 0, kind: input, shape index: {}]   ;;  %s2932_s1 = inlined_call_operand.vmem [shape: f32[10,2], index: 1, kind: input, shape index: {}]   ;;  %s2933_s2 = inlined_call_operand.vmem [shape: f32[10], index: 2, kind: input, shape index: {}]   ;;  %s2934_s3 = inlined_call_operand.vmem [shape: f32[10,10], index: 3, kind: input, shape index: {}]   ;;  %s2935_s4 = inlined_call_operand.vmem [shape: f32[10], index: 4, kind: input, shape index: {}]   ;;  %s2936_s5 = inlined_call_operand.vmem [shape: f32[10], index: 5, kind: input, shape index: {}]   ;;  %s2937_s6 = inlined_call_operand.<no memory space> [shape: f32[1], index: 6, kind: input, shape index: {}]   ;;  %s2938_s7 = inlined_call_operand.hbm [shape: f32[48,128], index: 7, kind: output, shape index: {}]  }
   0x1   :  { %2944 = sst [smem:[#allocation23_spill]] %s2932_s1 }
   0x2   :  { %2945 = sst [smem:[#allocation24_spill]] %s2933_s2 }
   0x3   :  { %12 = sst [smem:[#allocation2]] %s2937_s6 }
   0x4   :  { %13 = vsyncpa [#allocation4], 0 }
   0x5   :  { %15 = vsyncpa [#allocation4 + $0x1], 0 }
   0x6   :  { %16 = vsyncpa [#allocation6], 0 }
   0x7   :  { %17 = vsyncpa [#allocation9], 0 }
   0x8   :  { %18 = vsyncpa [#allocation12], 0 }
   0x9   :  { %19 = vsyncpa [#allocation5], 0 }
   0xa   :  { %21 = vsyncpa [#allocation5 + $0x1], 0  ;;  %s1897_s26 = smov 0   ;;  %s1899_s27 = smov 0  }
   0xb   :  { %s1901_s28 = smov 0   ;;  %s1903_s29 = smov 0  }
   0xc LB: > { %s1918_s6 = sadd.s32 4294967295, %s1836_s29   ;;  %s1399_s30 = sadd.s32 4294967294, %s1836_s29   ;;  %s1836_s29 = sphi %s1903_s29, %s2983_s29   ;;  %s1832_s28 = sphi %s1901_s28, %s2982_s28   ;;  %s1828_s27 = sphi %s1899_s27, %s2981_s27   ;;  %s1824_s26 = sphi %s1897_s26, %s2980_s26  }
   0xd   : > { %s1922_s8 = sadd.s32 1, %s1836_s29   ;;  %s34_s9 = sadd.s32 1, %s1832_s28 }
   0xe   : > { %s31_s10 = ssub.s32 %s1836_s29, %s1922_s8  ;;  %p41_p0 = scmp.ne.s32.totalorder %s1832_s28, %s1828_s27 }
   0xf   : > { %p32_p1 = scmp.eq.s32.totalorder %s31_s10, 0  ;;  %p42_p2 = scmp.eq.s32.totalorder %s1836_s29, 0 }
  0x10   : > { %p47_p3 = scmp.ne.s32.totalorder %s1828_s27, %s1824_s26  ;;  %p2939_p4 = scmp.eq.s32.totalorder %s1918_s6, 0 }
  0x11   : > { %s1934_s11 = scalar_select %p32_p1, %s1832_s28, %s34_s9  }
  0x12   : > { %p1936_p5 = por %p42_p2, %p41_p0  ;;  %p1942_p6 = por %p2939_p4, %p47_p3 }
  0x13   : > { %p197_p7 = scmp.eq.s32.totalorder %s1918_s6, 2  ;;  %p203_p8 = scmp.eq.s32.totalorder %s1399_s30, 2 }
  0x14   : > { %s2946_s12 = scalar_select %p1936_p5, 1, 0 }
  0x15   : > { %s2947_s13 = scalar_select %p1942_p6, 1, 0 }
  0x16   : > { %p1400_p9 = scmp.ge.s32.totalorder %s1836_s29, 1  ;;  %p210_p10 = scmp.lt.s32.totalorder %s1836_s29, 4 }
  0x17   : > { %p1949_p11 = por %p197_p7, %p41_p0  ;;  %p1953_p12 = por %p203_p8, %p47_p3 }
  0x18   : > { %p1957_p13 = pnand %p1400_p9, %p210_p10  ;;  %s2951_s2 = sld [smem:[#allocation24_spill]] }
  0x19   : > { %s2948_s14 = scalar_select %p1949_p11, 1, 0 }
  0x1a   : > { %s2949_s15 = scalar_select %p1953_p12, 1, 0 }
  0x1b   : > { %s2950_s16 = scalar_select %p1957_p13, 1, 0 }
  0x1c   : > { %p1605_p1 = pneg %p1957_p13  ;;  %s260_s22 = sshll.u32 %s2935_s4, 4  ;;  %s261_s22 = int_to_ptr.vmem [resolvable:$true] %s260_s22 }
  0x1d   : > { %s2953_s1 = sld [smem:[#allocation23_spill]] }
  0x1e   : > { %s236_s19 = sshll.u32 %s2951_s2, 4  ;;  %p1971_p0 = pnand %p1605_p1, %p2939_p4  ;;  %s237_s19 = int_to_ptr.vmem [resolvable:$true] %s236_s19 }
  0x1f   : > { %s1683_s9 = scalar_lea.vmem %s237_s19, 16  ;;  %p1691_p9 = scmp.lt.s32.totalorder %s237_s19, %s237_s19 }
  0x20   : > { %p1684_p2 = scmp.ne.s32.totalorder %s237_s19, %s1683_s9  ;;  %p1982_p3 = pneg %p1971_p0 }
  0x21   : > { %p1692_p10 = scmp.lt.s32.totalorder %s1683_s9, %s1683_s9 }
  0x22   : > { %p1686_p7 = pnand %p1982_p3, %p1684_p2 }
  0x23   : > { %s222_s30 = sshll.u32 %s2953_s1, 4  ;;  %p1693_p1 = por %p1692_p10, %p1691_p9  ;;  %s1978_s30 = int_to_ptr.vmem [resolvable:$true] %s222_s30 }
  0x24   : > { %p1687_p8 = pneg %p1686_p7 }
  0x26   : > { %p1694_p4 = pnand %p1693_p1, %p1687_p8 }
  0x28   : > { %1697 = shalt.err (!%p1694_p4)
}
  0x29   : > { %s1838_s17 = smov [#allocation8]   ;;  %s1698_s18 = scalar_lea.vmem %s261_s22, 16 }
  0x2a   : > { %1611 = dma.vmem_to_smem (!%p1971_p0), %s237_s19, 16, %s1838_s17, [#allocation9]  }
  0x2b   : > { %p1699_p12 = scmp.ne.s32.totalorder %s261_s22, %s1698_s18  ;;  %p1706_p13 = scmp.lt.s32.totalorder %s261_s22, %s261_s22 }
  0x2c   : > { %p1707_p5 = scmp.lt.s32.totalorder %s1698_s18, %s1698_s18 }
  0x2d   : > { %p1701_p11 = pnand %p1699_p12, %p1982_p3 }
  0x2e   : > { %p1708_p2 = por %p1707_p5, %p1706_p13 }
  0x2f   : > { %p1702_p6 = pneg %p1701_p11 }
  0x31   : > { %p1709_p7 = pnand %p1708_p2, %p1702_p6 }
  0x33   : > { %1712 = shalt.err (!%p1709_p7)
}
  0x34   : > { %s1839_s20 = smov [#allocation11]   ;;  %s1713_s21 = scalar_lea.vmem %s1978_s30, 256 }
  0x35   : > { %1617 = dma.vmem_to_smem (!%p1971_p0), %s261_s22, 16, %s1839_s20, [#allocation12]  }
  0x36   : > { %p1714_p4 = scmp.ne.s32.totalorder %s1978_s30, %s1713_s21  ;;  %p1721_p11 = scmp.lt.s32.totalorder %s1978_s30, %s1978_s30 }
  0x37   : > { %p1722_p12 = scmp.lt.s32.totalorder %s1713_s21, %s1713_s21 }
  0x38   : > { %p1716_p8 = pnand %p1714_p4, %p1982_p3 }
  0x39   : > { %p1723_p10 = por %p1722_p12, %p1721_p11 }
  0x3a   : > { %p1717_p9 = pneg %p1716_p8 }
  0x3c   : > { %p1724_p5 = pnand %p1723_p10, %p1717_p9 }
  0x3e   : > { %1727 = shalt.err (!%p1724_p5)
}
  0x3f   : > { %s1840_s19 = smov [#allocation7]   ;;  %s1841_s24 = smov 128  }
  0x40   : > { %s1842_s25 = smov 8   ;;  %s246_s17 = sshll.u32 %s2934_s3, 4  ;;  %s247_s17 = int_to_ptr.vmem [resolvable:$true] %s246_s17 }
  0x41   : > { %1608 = dma.vmem_to_smem (!%p1971_p0), %s1978_s30, 256, %s1840_s19, [#allocation6], %s1841_s24, %s1841_s24, %s1842_s25  }
  0x42   : > { %s271_s21 = sshll.u32 %s2936_s5, 4  ;;  %s1728_s1 = scalar_lea.vmem %s247_s17, 256  ;;  %s272_s21 = int_to_ptr.vmem [resolvable:$true] %s271_s21 }
  0x43   : > { %p1729_p6 = scmp.ne.s32.totalorder %s247_s17, %s1728_s1  ;;  %p1736_p2 = scmp.lt.s32.totalorder %s247_s17, %s247_s17 }
  0x44   : > { %p1737_p7 = scmp.lt.s32.totalorder %s1728_s1, %s1728_s1 }
  0x45   : > { %p1731_p13 = pnand %p1729_p6, %p1982_p3 }
  0x46   : > { %p1738_p4 = por %p1737_p7, %p1736_p2 }
  0x47   : > { %p1732_p1 = pneg %p1731_p13 }
  0x49   : > { %p1739_p8 = pnand %p1738_p4, %p1732_p1 }
  0x4b   : > { %1742 = shalt.err (!%p1739_p8)
}
  0x4c   : > { %s1843_s30 = smov [#allocation10]   ;;  %s1743_s19 = scalar_lea.vmem %s272_s21, 16 }
  0x4d   : > { %1614 = dma.vmem_to_smem (!%p1971_p0), %s247_s17, 256, %s1843_s30, [#allocation9], %s1841_s24, %s1841_s24, %s1842_s25  }
  0x4e   : > { %p1744_p9 = scmp.ne.s32.totalorder %s272_s21, %s1743_s19  ;;  %p1751_p10 = scmp.lt.s32.totalorder %s272_s21, %s272_s21 }
  0x4f   : > { %p1752_p5 = scmp.lt.s32.totalorder %s1743_s19, %s1743_s19 }
  0x50   : > { %p1746_p11 = pnand %p1744_p9, %p1982_p3 }
  0x51   : > { %p1753_p6 = por %p1752_p5, %p1751_p10 }
  0x52   : > { %p1747_p12 = pneg %p1746_p11 }
  0x54   : > { %p1754_p13 = pnand %p1753_p6, %p1747_p12 }
  0x56   : > { %1757 = shalt.err (!%p1754_p13)
}
  0x57   : > { %s1844_s1 = smov [#allocation13]   ;;  %p1406_p1 = scmp.ge.s32.totalorder %s1836_s29, 3 }
  0x58   : > { %1620 = dma.vmem_to_smem (!%p1971_p0), %s272_s21, 16, %s1844_s1, [#allocation12]  }
  0x59   : > { %281 = sbr.rel (%p1406_p1) target bundleno = 111 (0x6f), region = 40 }
  0x60   : > { %s285_s10 = sand.u32 1, %s1832_s28   ;;  %s1572_s24 = sshll.u32 %s1836_s29, 8 }
  0x61   : > { %s1407_s25 = sshll.u32 %s285_s10, 5  ;;  %s295_s17 = scalar_lea.hbm %s2931_s0, %s1572_s24 }
  0x62   : > { %p2955_p3 = scmp.ne.s32.totalorder %s2946_s12, 0  ;;  %s289_s18 = scalar_lea.vmem [#allocation3], %s1407_s25 }
  0x63   : > { %s308_s20 = sshll.u32 %s289_s18, 4  ;;  %s1845_s30 = smov 768   ;;  %s309_s20 = int_to_ptr.vmem [resolvable:$true] %s308_s20 }
  0x64   : > { %s1584_s23 = scalar_select %p2955_p3, [#allocation0], [#allocation17] }
  0x65   : > { %1585 = sst [smem:[#allocation16]] (%p2955_p3), %s1845_s30  ;;  %s1846_s19 = smov 256  }
  0x66   : > { %s300_s21 = sld [smem:[%s1584_s23]]   ;;  %s1847_s1 = smov 2  }
  0x67   : > { %1586 = sst [smem:[#allocation16 + $0x1]] (%p2955_p3), %s1846_s19  ;;  %s1848_s2 = smov 128  }
  0x68   : > { %1587 = sst [smem:[#allocation16 + $0x2]] (%p2955_p3), %s1847_s1  ;;  %s1849_s25 = smov 8  }
  0x69   : > { %1588 = sst [smem:[#allocation16 + $0x3]] (%p2955_p3), %s1848_s2  ;;  %s286_s9 = scalar_lea.sflag [#allocation4], %s285_s10 }
  0x6a   : > { %1589 = sst [smem:[#allocation16 + $0x4]] (%p2955_p3), %s1848_s2  ;;  %s1850_s23 = smov [#allocation15]  }
  0x6b   : > { %1590 = sst [smem:[#allocation16 + $0x5]] (%p2955_p3), %s1849_s25 }
  0x6c   : > { %s1410_s24 = sshll.u32 %s300_s21, 26 }
  0x6d   : > { %s1411_s22 = sadd.s32 134217728, %s1410_s24 }
  0x6e   : > { %1591 = dma.general (%p2955_p3), %s295_s17, 512, %s309_s20, %s286_s9, %s1850_s23, [#allocation16], %s1411_s22, 0  }
  0x6f PF: > { %p2956_p0 = scmp.ne.s32.totalorder %s2950_s16, 0 }
  0x70   : > { %s2042_s18 = sand.u32 (!%p2956_p0), 1, %s1828_s27   ;;  %p2957_p2 = scmp.ne.s32.totalorder (!%p2956_p0), %s2947_s13, 0 }
  0x71   : > { %333 = sbr.rel (%p2956_p0) target bundleno = 337 (0x151), region = 48  ;;  %s1413_s2 = sshll.u32 (!%p2956_p0), %s2042_s18, 5 }
  0x72   : > { %s336_s21 = scalar_lea.sflag (!%p2956_p0), [#allocation4], %s2042_s18  ;;  %s339_s30 = scalar_lea.vmem (!%p2956_p0), [#allocation3], %s1413_s2 }
  0x78   : > { %1803 = dma.done.wait (%p2957_p2), %s336_s21, 512  }
  0x79   : > { %1805 = vsyncadd (%p2957_p2), %s336_s21, 4294966784  ;;  %p2958_p7 = scmp.eq.s32.totalorder %s1918_s6, 0 }
  0x7b   : > { %1807 = dma.done.wait (%p2958_p7), [#allocation6], 256   ;;  %p2959_p4 = pmov %p2958_p7 }
  0x7d   : > { %1809 = vsyncadd (%p2959_p4), [#allocation6], 4294967040  ;;  %p2960_p8 = pmov %p2959_p4 }
  0x7e   : > { %p2961_p9 = pmov %p2959_p4 }
  0x7f   : > { %1811 = dma.done.wait (%p2960_p8), [#allocation9], 272  }
  0x80   : > { %1813 = vsyncadd (%p2961_p9), [#allocation9], 4294967024  ;;  %p2962_p11 = pmov %p2959_p4 }
  0x81   : > { %p2963_p12 = pmov %p2959_p4 }
  0x82   : > { %1815 = dma.done.wait (%p2962_p11), [#allocation12], 32  }
  0x83   : > { %1817 = vsyncadd (%p2963_p12), [#allocation12], 4294967264 }
  0x84   : > { %364 = sfence }
  0x85   : > { %s398_s12 = sld [smem:[#allocation7]]  ;;  %s1422_s13 = sld [smem:[#allocation7 + $0x1]]  ;;  %v2066_v0 = vld [vmem:[%s339_s30] sm:$0xff]  ;;  %v2068_v1 = vld [vmem:[%s339_s30 + $0x8] sm:$0xff]  ;;  %v2074_v2 = vld [vmem:[%s339_s30 + $0x10] sm:$0xff] }
  0x86   : > { %s2062_s16 = sld [smem:[#allocation8]]  ;;  %s1424_s17 = sld [smem:[#allocation7 + $0x81]]  ;;  %v2076_v3 = vld [vmem:[%s339_s30 + $0x18] sm:$0xff] }
  0x87   : > { %s1423_s10 = sld [smem:[#allocation7 + $0x80]]  ;;  %s2064_s20 = sld [smem:[#allocation8 + $0x1]] }
  0x88   : > { %s2070_s19 = sld [smem:[#allocation7 + $0x100]]  ;;  %s2072_s1 = sld [smem:[#allocation7 + $0x101]] }
  0x89   : > { %s2078_s24 = sld [smem:[#allocation8 + $0x2]]  ;;  %s2080_s25 = sld [smem:[#allocation7 + $0x180]] }
  0x8a   : > { %s2087_s22 = sld [smem:[#allocation7 + $0x181]]  ;;  %s2089_s9 = sld [smem:[#allocation8 + $0x3]] }
  0x8b   : > { %v399_v4 = vstv %s398_s12  ;;  %v403_v7 = vstv %s1422_s13  ;;  %s2094_s23 = sld [smem:[#allocation7 + $0x200]]  ;;  %s2096_s2 = sld [smem:[#allocation7 + $0x201]] }
  0x8c   : > { %v400_v5 = vmul.f32 %v399_v4, %v2066_v0  ;;  %v401_v6 = vmul.f32 %v399_v4, %v2068_v1  ;;  %v404_v8 = vmul.f32 %v2074_v2, %v403_v7  ;;  %v405_v9 = vmul.f32 %v2076_v3, %v403_v7  ;;  %s2100_s21 = sld [smem:[#allocation8 + $0x4]]  ;;  %s2102_s30 = sld [smem:[#allocation7 + $0x280]] }
  0x8d   : > { %v409_v10 = vstv %s2062_s16  ;;  %v415_v11 = vstv %s1423_s10  ;;  %v419_v14 = vstv %s1424_s17  ;;  %v425_v15 = vstv %s2064_s20  ;;  %s2116_s12 = sld [smem:[#allocation7 + $0x281]]  ;;  %s2118_s13 = sld [smem:[#allocation8 + $0x5]] }
  0x8e   : > { %v416_v12 = vmul.f32 %v415_v11, %v2066_v0  ;;  %v417_v13 = vmul.f32 %v415_v11, %v2068_v1  ;;  %v406_v16 = vadd.f32 %v404_v8, %v400_v5  ;;  %v407_v17 = vadd.f32 %v405_v9, %v401_v6  ;;  %s2128_s16 = sld [smem:[#allocation7 + $0x300]]  ;;  %s2130_s10 = sld [smem:[#allocation7 + $0x301]] }
  0x8f   : > { %v420_v18 = vmul.f32 %v2074_v2, %v419_v14  ;;  %v421_v19 = vmul.f32 %v2076_v3, %v419_v14  ;;  %v431_v20 = vstv %s2070_s19  ;;  %v435_v21 = vstv %s2072_s1  ;;  %s2142_s17 = sld [smem:[#allocation8 + $0x6]]  ;;  %s2144_s20 = sld [smem:[#allocation7 + $0x380]] }
  0x90   : > { %v441_v22 = vstv %s2078_s24  ;;  %v447_v23 = vstv %s2080_s25  ;;  %v410_v24 = vadd.f32 %v409_v10, %v406_v16  ;;  %v411_v25 = vadd.f32 %v409_v10, %v407_v17  ;;  %s2152_s19 = sld [smem:[#allocation7 + $0x381]]  ;;  %s2154_s1 = sld [smem:[#allocation8 + $0x7]] }
  0x91   : > { %v422_v26 = vadd.f32 %v420_v18, %v416_v12  ;;  %v423_v27 = vadd.f32 %v421_v19, %v417_v13  ;;  %v432_v28 = vmul.f32 %v431_v20, %v2066_v0  ;;  %v433_v29 = vmul.f32 %v431_v20, %v2068_v1  ;;  %s2158_s24 = sld [smem:[#allocation7 + $0x400]]  ;;  %s2160_s25 = sld [smem:[#allocation7 + $0x401]] }
  0x92   : > { %v436_v30 = vmul.f32 %v2074_v2, %v435_v21  ;;  %v437_v31 = vmul.f32 %v2076_v3, %v435_v21  ;;  %v2112_v32 = vmax.f32 %v410_v24, 0.0  ;;  %v2114_v33 = vmax.f32 %v411_v25, 0.0  ;;  %p2978_p5 = scmp.ne.s32.totalorder %s2948_s14, 0 }
  0x93   : > { %v426_v34 = vadd.f32 %v425_v15, %v422_v26  ;;  %v427_v35 = vadd.f32 %v425_v15, %v423_v27  ;;  %v448_v38 = vmul.f32 %v447_v23, %v2066_v0  ;;  %v449_v39 = vmul.f32 %v447_v23, %v2068_v1 }
  0x94   : > { %v438_v36 = vadd.f32 %v436_v30, %v432_v28  ;;  %v439_v37 = vadd.f32 %v437_v31, %v433_v29  ;;  %v451_v42 = vstv %s2087_s22  ;;  %v457_v43 = vstv %s2089_s9  ;;  %s2168_s22 = sld [smem:[#allocation8 + $0x8]] }
  0x95   : > { %v2122_v40 = vmax.f32 %v426_v34, 0.0  ;;  %v2124_v41 = vmax.f32 %v427_v35, 0.0  ;;  %v452_v46 = vmul.f32 %v2074_v2, %v451_v42  ;;  %v453_v47 = vmul.f32 %v2076_v3, %v451_v42  ;;  %s2170_s9 = sld [smem:[#allocation7 + $0x480]] }
  0x96   : > { %v442_v44 = vadd.f32 %v441_v22, %v438_v36  ;;  %v443_v45 = vadd.f32 %v441_v22, %v439_v37  ;;  %v463_v48 = vstv %s2094_s23  ;;  %v467_v49 = vstv %s2096_s2  ;;  %s2184_s23 = sld [smem:[#allocation7 + $0x481]] }
  0x97   : > { %v473_v50 = vstv %s2100_s21  ;;  %v479_v51 = vstv %s2102_s30  ;;  %v454_v54 = vadd.f32 %v452_v46, %v448_v38  ;;  %v455_v55 = vadd.f32 %v453_v47, %v449_v39  ;;  %s2186_s2 = sld [smem:[#allocation8 + $0x9]]  ;;  %s2196_s21 = sld [smem:[#allocation10]] }
  0x98   : > { %v2138_v52 = vmax.f32 %v442_v44, 0.0  ;;  %v2140_v53 = vmax.f32 %v443_v45, 0.0  ;;  %v464_v56 = vmul.f32 %v463_v48, %v2066_v0  ;;  %v465_v57 = vmul.f32 %v463_v48, %v2068_v1  ;;  %s2198_s30 = sld [smem:[#allocation11]] }
  0x99   : > { %v468_v58 = vmul.f32 %v2074_v2, %v467_v49  ;;  %v469_v59 = vmul.f32 %v2076_v3, %v467_v49  ;;  %v458_v60 = vadd.f32 %v457_v43, %v454_v54  ;;  %v459_v61 = vadd.f32 %v457_v43, %v455_v55 }
  0x9a   : > { %v480_v62 = vmul.f32 %v479_v51, %v2066_v0  ;;  %v481_v63 = vmul.f32 %v479_v51, %v2068_v1  ;;  %v483_v6 = vstv %s2116_s12  ;;  %v489_v7 = vstv %s2118_s13  ;;  %s2206_s12 = sld [smem:[#allocation10 + $0x1]]  ;;  %s2208_s13 = sld [smem:[#allocation10 + $0x2]] }
  0x9b   : > { %v470_v4 = vadd.f32 %v468_v58, %v464_v56  ;;  %v471_v5 = vadd.f32 %v469_v59, %v465_v57  ;;  %v2162_v8 = vmax.f32 %v458_v60, 0.0  ;;  %v2164_v9 = vmax.f32 %v459_v61, 0.0 }
  0x9c   : > { %v484_v10 = vmul.f32 %v2074_v2, %v483_v6  ;;  %v485_v11 = vmul.f32 %v2076_v3, %v483_v6  ;;  %v495_v14 = vstv %s2128_s16  ;;  %v499_v15 = vstv %s2130_s10  ;;  %s2220_s16 = sld [smem:[#allocation10 + $0x3]]  ;;  %s2222_s10 = sld [smem:[#allocation10 + $0x4]] }
  0x9d   : > { %v474_v12 = vadd.f32 %v473_v50, %v470_v4  ;;  %v475_v13 = vadd.f32 %v473_v50, %v471_v5  ;;  %v496_v18 = vmul.f32 %v495_v14, %v2066_v0  ;;  %v497_v19 = vmul.f32 %v495_v14, %v2068_v1 }
  0x9e   : > { %v486_v16 = vadd.f32 %v484_v10, %v480_v62  ;;  %v487_v17 = vadd.f32 %v485_v11, %v481_v63  ;;  %v500_v22 = vmul.f32 %v2074_v2, %v499_v15  ;;  %v501_v23 = vmul.f32 %v2076_v3, %v499_v15 }
  0x9f   : > { %v2176_v20 = vmax.f32 %v474_v12, 0.0  ;;  %v2178_v21 = vmax.f32 %v475_v13, 0.0  ;;  %v505_v26 = vstv %s2142_s17  ;;  %v511_v27 = vstv %s2144_s20  ;;  %s2232_s17 = sld [smem:[#allocation10 + $0x5]]  ;;  %s2234_s20 = sld [smem:[#allocation10 + $0x6]] }
  0xa0   : > { %v490_v24 = vadd.f32 %v489_v7, %v486_v16  ;;  %v491_v25 = vadd.f32 %v489_v7, %v487_v17  ;;  %v502_v28 = vadd.f32 %v500_v22, %v496_v18  ;;  %v503_v29 = vadd.f32 %v501_v23, %v497_v19 }
  0xa1   : > { %v512_v30 = vmul.f32 %v511_v27, %v2066_v0  ;;  %v513_v31 = vmul.f32 %v511_v27, %v2068_v1  ;;  %v515_v36 = vstv %s2152_s19  ;;  %v521_v37 = vstv %s2154_s1  ;;  %s2246_s19 = sld [smem:[#allocation10 + $0x7]]  ;;  %s2248_s1 = sld [smem:[#allocation10 + $0x8]] }
  0xa2   : > { %v2190_v34 = vmax.f32 %v490_v24, 0.0  ;;  %v2192_v35 = vmax.f32 %v491_v25, 0.0  ;;  %v506_v38 = vadd.f32 %v505_v26, %v502_v28  ;;  %v507_v39 = vadd.f32 %v505_v26, %v503_v29 }
  0xa3   : > { %v516_v42 = vmul.f32 %v2074_v2, %v515_v36  ;;  %v517_v43 = vmul.f32 %v2076_v3, %v515_v36  ;;  %v527_v44 = vstv %s2158_s24  ;;  %v531_v45 = vstv %s2160_s25  ;;  %s2254_s24 = sld [smem:[#allocation10 + $0x9]]  ;;  %s2256_s25 = sld [smem:[#allocation10 + $0x80]] }
  0xa4   : > { %v537_v46 = vstv %s2168_s22  ;;  %v543_v47 = vstv %s2170_s9  ;;  %v2210_v48 = vmax.f32 %v506_v38, 0.0  ;;  %v2212_v49 = vmax.f32 %v507_v39, 0.0  ;;  %s2270_s22 = sld [smem:[#allocation11 + $0x1]] }
  0xa5   : > { %v518_v50 = vadd.f32 %v516_v42, %v512_v30  ;;  %v519_v51 = vadd.f32 %v517_v43, %v513_v31  ;;  %v528_v54 = vmul.f32 %v527_v44, %v2066_v0  ;;  %v529_v55 = vmul.f32 %v527_v44, %v2068_v1  ;;  %s2272_s9 = sld [smem:[#allocation10 + $0x81]] }
  0xa6   : > { %v532_v56 = vmul.f32 %v2074_v2, %v531_v45  ;;  %v533_v57 = vmul.f32 %v2076_v3, %v531_v45  ;;  %v544_v60 = vmul.f32 %v543_v47, %v2066_v0  ;;  %v545_v61 = vmul.f32 %v543_v47, %v2068_v1 }
  0xa7   : > { %v522_v58 = vadd.f32 %v521_v37, %v518_v50  ;;  %v523_v59 = vadd.f32 %v521_v37, %v519_v51  ;;  %v547_v4 = vstv %s2184_s23  ;;  %v553_v5 = vstv %s2186_s2  ;;  %s2278_s23 = sld [smem:[#allocation10 + $0x82]]  ;;  %s2280_s2 = sld [smem:[#allocation10 + $0x83]] }
  0xa8   : > { %v534_v62 = vadd.f32 %v532_v56, %v528_v54  ;;  %v535_v63 = vadd.f32 %v533_v57, %v529_v55  ;;  %v548_v0 = vmul.f32 %v2074_v2, %v547_v4  ;;  %v549_v10 = vmul.f32 %v2076_v3, %v547_v4 }
  0xa9   : > { %v2226_v6 = vmax.f32 %v522_v58, 0.0  ;;  %v2228_v7 = vmax.f32 %v523_v59, 0.0  ;;  %v559_v12 = vstv %s2196_s21  ;;  %v563_v13 = vstv %s2198_s30  ;;  %s2286_s21 = sld [smem:[#allocation10 + $0x84]]  ;;  %s2288_s30 = sld [smem:[#allocation10 + $0x85]] }
  0xaa   : > { %v538_v1 = vadd.f32 %v537_v46, %v534_v62  ;;  %v539_v11 = vadd.f32 %v537_v46, %v535_v63  ;;  %v550_v14 = vadd.f32 %v548_v0, %v544_v60  ;;  %v551_v15 = vadd.f32 %v549_v10, %v545_v61 }
  0xab   : > { %v560_v16 = vmul.f32 %v559_v12, %v2112_v32  ;;  %v561_v17 = vmul.f32 %v559_v12, %v2114_v33  ;;  %v567_v2 = vstv %s2206_s12  ;;  %v571_v3 = vstv %s2208_s13  ;;  %s2296_s12 = sld [smem:[#allocation10 + $0x86]]  ;;  %s2298_s13 = sld [smem:[#allocation10 + $0x87]] }
  0xac   : > { %v2240_v18 = vmax.f32 %v538_v1, 0.0  ;;  %v2242_v19 = vmax.f32 %v539_v11, 0.0  ;;  %v554_v22 = vadd.f32 %v553_v5, %v550_v14  ;;  %v555_v23 = vadd.f32 %v553_v5, %v551_v15 }
  0xad   : > { %v564_v24 = vadd.f32 %v563_v13, %v560_v16  ;;  %v565_v25 = vadd.f32 %v563_v13, %v561_v17  ;;  %v568_v26 = vmul.f32 %v567_v2, %v2122_v40  ;;  %v569_v27 = vmul.f32 %v567_v2, %v2124_v41 }
  0xae   : > { %v572_v28 = vmul.f32 %v571_v3, %v2138_v52  ;;  %v573_v29 = vmul.f32 %v571_v3, %v2140_v53  ;;  %v2258_v30 = vmax.f32 %v554_v22, 0.0  ;;  %v2260_v31 = vmax.f32 %v555_v23, 0.0 }
  0xaf   : > { %v577_v36 = vstv %s2220_s16  ;;  %v583_v37 = vstv %s2222_s10  ;;  %v589_v46 = vstv %s2232_s17  ;;  %v595_v47 = vstv %s2234_s20  ;;  %s2302_s16 = sld [smem:[#allocation10 + $0x88]]  ;;  %s2304_s10 = sld [smem:[#allocation10 + $0x89]] }
  0xb0   : > { %v574_v38 = vadd.f32 %v572_v28, %v564_v24  ;;  %v575_v39 = vadd.f32 %v573_v29, %v565_v25  ;;  %v578_v42 = vmul.f32 %v577_v36, %v2162_v8  ;;  %v579_v43 = vmul.f32 %v577_v36, %v2164_v9  ;;  %s2320_s17 = sld [smem:[#allocation10 + $0x100]]  ;;  %s2322_s20 = sld [smem:[#allocation11 + $0x2]] }
  0xb1   : > { %v584_v44 = vmul.f32 %v583_v37, %v2176_v20  ;;  %v585_v45 = vmul.f32 %v583_v37, %v2178_v21  ;;  %v590_v54 = vmul.f32 %v589_v46, %v2190_v34  ;;  %v591_v55 = vmul.f32 %v589_v46, %v2192_v35 }
  0xb2   : > { %v580_v50 = vadd.f32 %v578_v42, %v568_v26  ;;  %v581_v51 = vadd.f32 %v579_v43, %v569_v27  ;;  %v596_v58 = vmul.f32 %v595_v47, %v2210_v48  ;;  %v597_v59 = vmul.f32 %v595_v47, %v2212_v49 }
  0xb3   : > { %v586_v56 = vadd.f32 %v584_v44, %v574_v38  ;;  %v587_v57 = vadd.f32 %v585_v45, %v575_v39  ;;  %v601_v62 = vstv %s2246_s19  ;;  %v607_v63 = vstv %s2248_s1  ;;  %s2328_s19 = sld [smem:[#allocation10 + $0x101]]  ;;  %s2330_s1 = sld [smem:[#allocation10 + $0x102]] }
  0xb4   : > { %v592_v60 = vadd.f32 %v590_v54, %v580_v50  ;;  %v593_v61 = vadd.f32 %v591_v55, %v581_v51  ;;  %v602_v0 = vmul.f32 %v601_v62, %v2226_v6  ;;  %v603_v10 = vmul.f32 %v601_v62, %v2228_v7 }
  0xb5   : > { %v598_v4 = vadd.f32 %v596_v58, %v586_v56  ;;  %v599_v5 = vadd.f32 %v597_v59, %v587_v57  ;;  %v608_v1 = vmul.f32 %v607_v63, %v2240_v18  ;;  %v609_v11 = vmul.f32 %v607_v63, %v2242_v19 }
  0xb6   : > { %v613_v12 = vstv %s2254_s24  ;;  %v623_v13 = vstv %s2256_s25  ;;  %v604_v14 = vadd.f32 %v602_v0, %v592_v60  ;;  %v605_v15 = vadd.f32 %v603_v10, %v593_v61  ;;  %s2340_s24 = sld [smem:[#allocation10 + $0x103]]  ;;  %s2342_s25 = sld [smem:[#allocation10 + $0x104]] }
  0xb7   : > { %v614_v16 = vmul.f32 %v613_v12, %v2258_v30  ;;  %v615_v17 = vmul.f32 %v613_v12, %v2260_v31  ;;  %v610_v2 = vadd.f32 %v608_v1, %v598_v4  ;;  %v611_v3 = vadd.f32 %v609_v11, %v599_v5 }
  0xb8   : > { %v624_v22 = vmul.f32 %v623_v13, %v2112_v32  ;;  %v625_v23 = vmul.f32 %v623_v13, %v2114_v33  ;;  %v627_v26 = vstv %s2270_s22  ;;  %v631_v27 = vstv %s2272_s9  ;;  %s2352_s22 = sld [smem:[#allocation10 + $0x105]]  ;;  %s2354_s9 = sld [smem:[#allocation10 + $0x106]] }
  0xb9   : > { %v616_v24 = vadd.f32 %v614_v16, %v604_v14  ;;  %v617_v25 = vadd.f32 %v615_v17, %v605_v15  ;;  %v632_v36 = vmul.f32 %v631_v27, %v2122_v40  ;;  %v633_v37 = vmul.f32 %v631_v27, %v2124_v41 }
  0xba   : > { %v628_v28 = vadd.f32 %v627_v26, %v624_v22  ;;  %v629_v29 = vadd.f32 %v627_v26, %v625_v23  ;;  %v635_v42 = vstv %s2278_s23  ;;  %v641_v43 = vstv %s2280_s2  ;;  %s2360_s23 = sld [smem:[#allocation10 + $0x107]]  ;;  %s2362_s2 = sld [smem:[#allocation10 + $0x108]] }
  0xbb   : > { %v2310_v38 = vadd.f32 %v616_v24, %v610_v2  ;;  %v2312_v39 = vadd.f32 %v617_v25, %v611_v3  ;;  %v636_v44 = vmul.f32 %v635_v42, %v2138_v52  ;;  %v637_v45 = vmul.f32 %v635_v42, %v2140_v53 }
  0xbc   : > { %v642_v46 = vmul.f32 %v641_v43, %v2162_v8  ;;  %v643_v47 = vmul.f32 %v641_v43, %v2164_v9  ;;  %v647_v54 = vstv %s2286_s21  ;;  %v653_v55 = vstv %s2288_s30  ;;  %s2376_s21 = sld [smem:[#allocation10 + $0x109]]  ;;  %s2378_s30 = sld [smem:[#allocation10 + $0x180]] }
  0xbd   : > { %v620_v50 = vmax.f32 %v2310_v38, 0.0  ;;  %v621_v51 = vmax.f32 %v2312_v39, 0.0  ;;  %v638_v56 = vadd.f32 %v636_v44, %v628_v28  ;;  %v639_v57 = vadd.f32 %v637_v45, %v629_v29 }
  0xbe   : > { %v644_v58 = vadd.f32 %v642_v46, %v632_v36  ;;  %v645_v59 = vadd.f32 %v643_v47, %v633_v37  ;;  %v648_v60 = vmul.f32 %v647_v54, %v2176_v20  ;;  %v649_v61 = vmul.f32 %v647_v54, %v2178_v21 }
  0xbf   : > { %v654_v62 = vmul.f32 %v653_v55, %v2190_v34  ;;  %v655_v63 = vmul.f32 %v653_v55, %v2192_v35  ;;  %v659_v4 = vstv %s2296_s12  ;;  %v665_v5 = vstv %s2298_s13  ;;  %s2386_s12 = sld [smem:[#allocation11 + $0x3]]  ;;  %s2388_s13 = sld [smem:[#allocation10 + $0x181]] }
  0xc0   : > { %v671_v0 = vstv %s2302_s16  ;;  %v677_v10 = vstv %s2304_s10  ;;  %v650_v1 = vadd.f32 %v648_v60, %v638_v56  ;;  %v651_v11 = vadd.f32 %v649_v61, %v639_v57  ;;  %s2394_s16 = sld [smem:[#allocation10 + $0x182]]  ;;  %s2396_s10 = sld [smem:[#allocation10 + $0x183]] }
  0xc1   : > { %v656_v12 = vadd.f32 %v654_v62, %v644_v58  ;;  %v657_v13 = vadd.f32 %v655_v63, %v645_v59  ;;  %v660_v14 = vmul.f32 %v659_v4, %v2210_v48  ;;  %v661_v15 = vmul.f32 %v659_v4, %v2212_v49 }
  0xc2   : > { %v666_v16 = vmul.f32 %v665_v5, %v2226_v6  ;;  %v667_v17 = vmul.f32 %v665_v5, %v2228_v7  ;;  %v672_v2 = vmul.f32 %v671_v0, %v2240_v18  ;;  %v673_v3 = vmul.f32 %v671_v0, %v2242_v19 }
  0xc3   : > { %v678_v22 = vmul.f32 %v677_v10, %v2258_v30  ;;  %v679_v23 = vmul.f32 %v677_v10, %v2260_v31  ;;  %v662_v24 = vadd.f32 %v660_v14, %v650_v1  ;;  %v663_v25 = vadd.f32 %v661_v15, %v651_v11 }
  0xc4   : > { %v668_v26 = vadd.f32 %v666_v16, %v656_v12  ;;  %v669_v27 = vadd.f32 %v667_v17, %v657_v13  ;;  %v687_v28 = vstv %s2320_s17  ;;  %v691_v29 = vstv %s2322_s20  ;;  %s2404_s17 = sld [smem:[#allocation10 + $0x184]]  ;;  %s2406_s20 = sld [smem:[#allocation10 + $0x185]] }
  0xc5   : > { %v695_v36 = vstv %s2328_s19  ;;  %v699_v37 = vstv %s2330_s1  ;;  %v674_v42 = vadd.f32 %v672_v2, %v662_v24  ;;  %v675_v43 = vadd.f32 %v673_v3, %v663_v25  ;;  %s2414_s19 = sld [smem:[#allocation10 + $0x186]]  ;;  %s2416_s1 = sld [smem:[#allocation10 + $0x187]] }
  0xc6   : > { %v680_v44 = vadd.f32 %v678_v22, %v668_v26  ;;  %v681_v45 = vadd.f32 %v679_v23, %v669_v27  ;;  %v688_v46 = vmul.f32 %v687_v28, %v2112_v32  ;;  %v689_v47 = vmul.f32 %v687_v28, %v2114_v33 }
  0xc7   : > { %v696_v54 = vmul.f32 %v695_v36, %v2122_v40  ;;  %v697_v55 = vmul.f32 %v695_v36, %v2124_v41  ;;  %v700_v58 = vmul.f32 %v699_v37, %v2138_v52  ;;  %v701_v59 = vmul.f32 %v699_v37, %v2140_v53 }
  0xc8   : > { %v2368_v56 = vadd.f32 %v680_v44, %v674_v42  ;;  %v2370_v57 = vadd.f32 %v681_v45, %v675_v43  ;;  %v692_v60 = vadd.f32 %v691_v29, %v688_v46  ;;  %v693_v61 = vadd.f32 %v691_v29, %v689_v47 }
  0xc9   : > { %v705_v62 = vstv %s2340_s24  ;;  %v711_v63 = vstv %s2342_s25  ;;  %v717_v16 = vstv %s2352_s22  ;;  %v723_v17 = vstv %s2354_s9  ;;  %s2426_s24 = sld [smem:[#allocation10 + $0x188]]  ;;  %s2428_s25 = sld [smem:[#allocation10 + $0x189]] }
  0xca   : > { %v706_v0 = vmul.f32 %v705_v62, %v2162_v8  ;;  %v707_v10 = vmul.f32 %v705_v62, %v2164_v9  ;;  %v702_v1 = vadd.f32 %v700_v58, %v692_v60  ;;  %v703_v11 = vadd.f32 %v701_v59, %v693_v61  ;;  %s2440_s22 = sld [smem:[#allocation10 + $0x200]]  ;;  %s2442_s9 = sld [smem:[#allocation11 + $0x4]] }
  0xcb   : > { %v712_v12 = vmul.f32 %v711_v63, %v2176_v20  ;;  %v713_v13 = vmul.f32 %v711_v63, %v2178_v21  ;;  %v718_v22 = vmul.f32 %v717_v16, %v2190_v34  ;;  %v719_v23 = vmul.f32 %v717_v16, %v2192_v35 }
  0xcc   : > { %v708_v14 = vadd.f32 %v706_v0, %v696_v54  ;;  %v709_v15 = vadd.f32 %v707_v10, %v697_v55  ;;  %v724_v24 = vmul.f32 %v723_v17, %v2210_v48  ;;  %v725_v25 = vmul.f32 %v723_v17, %v2212_v49 }
  0xcd   : > { %v714_v2 = vadd.f32 %v712_v12, %v702_v1  ;;  %v715_v3 = vadd.f32 %v713_v13, %v703_v11  ;;  %v729_v26 = vstv %s2360_s23  ;;  %v735_v27 = vstv %s2362_s2  ;;  %s2448_s23 = sld [smem:[#allocation10 + $0x201]]  ;;  %s2450_s2 = sld [smem:[#allocation10 + $0x202]] }
  0xce   : > { %v720_v28 = vadd.f32 %v718_v22, %v708_v14  ;;  %v721_v29 = vadd.f32 %v719_v23, %v709_v15  ;;  %v730_v36 = vmul.f32 %v729_v26, %v2226_v6  ;;  %v731_v37 = vmul.f32 %v729_v26, %v2228_v7 }
  0xcf   : > { %v726_v42 = vadd.f32 %v724_v24, %v714_v2  ;;  %v727_v43 = vadd.f32 %v725_v25, %v715_v3  ;;  %v736_v44 = vmul.f32 %v735_v27, %v2240_v18  ;;  %v737_v45 = vmul.f32 %v735_v27, %v2242_v19 }
  0xd0   : > { %v732_v46 = vadd.f32 %v730_v36, %v720_v28  ;;  %v733_v47 = vadd.f32 %v731_v37, %v721_v29  ;;  %v741_v54 = vstv %s2376_s21  ;;  %v751_v55 = vstv %s2378_s30  ;;  %s2458_s21 = sld [smem:[#allocation10 + $0x203]]  ;;  %s2460_s30 = sld [smem:[#allocation10 + $0x204]] }
  0xd1   : > { %v738_v58 = vadd.f32 %v736_v44, %v726_v42  ;;  %v739_v59 = vadd.f32 %v737_v45, %v727_v43  ;;  %v742_v60 = vmul.f32 %v741_v54, %v2258_v30  ;;  %v743_v61 = vmul.f32 %v741_v54, %v2260_v31 }
  0xd2   : > { %v752_v62 = vmul.f32 %v751_v55, %v2112_v32  ;;  %v753_v63 = vmul.f32 %v751_v55, %v2114_v33  ;;  %v755_v0 = vstv %s2386_s12  ;;  %v759_v10 = vstv %s2388_s13  ;;  %s2464_s12 = sld [smem:[#allocation10 + $0x205]]  ;;  %s2466_s13 = sld [smem:[#allocation10 + $0x206]] }
  0xd3   : > { %v744_v1 = vadd.f32 %v742_v60, %v732_v46  ;;  %v745_v11 = vadd.f32 %v743_v61, %v733_v47  ;;  %v760_v12 = vmul.f32 %v759_v10, %v2122_v40  ;;  %v761_v13 = vmul.f32 %v759_v10, %v2124_v41 }
  0xd4   : > { %v756_v14 = vadd.f32 %v755_v0, %v752_v62  ;;  %v757_v15 = vadd.f32 %v755_v0, %v753_v63  ;;  %v763_v16 = vstv %s2394_s16  ;;  %v769_v17 = vstv %s2396_s10  ;;  %s2478_s16 = sld [smem:[#allocation10 + $0x207]]  ;;  %s2480_s10 = sld [smem:[#allocation10 + $0x208]] }
  0xd5   : > { %v2430_v2 = vadd.f32 %v744_v1, %v738_v58  ;;  %v2432_v3 = vadd.f32 %v745_v11, %v739_v59  ;;  %v764_v22 = vmul.f32 %v763_v16, %v2138_v52  ;;  %v765_v23 = vmul.f32 %v763_v16, %v2140_v53 }
  0xd6   : > { %v770_v24 = vmul.f32 %v769_v17, %v2162_v8  ;;  %v771_v25 = vmul.f32 %v769_v17, %v2164_v9  ;;  %v775_v26 = vstv %s2404_s17  ;;  %v781_v27 = vstv %s2406_s20  ;;  %s2484_s17 = sld [smem:[#allocation10 + $0x209]]  ;;  %s2486_s20 = sld [smem:[#allocation10 + $0x280]] }
  0xd7   : > { %v766_v36 = vadd.f32 %v764_v22, %v756_v14  ;;  %v767_v37 = vadd.f32 %v765_v23, %v757_v15  ;;  %v776_v44 = vmul.f32 %v775_v26, %v2176_v20  ;;  %v777_v45 = vmul.f32 %v775_v26, %v2178_v21 }
  0xd8   : > { %v772_v42 = vadd.f32 %v770_v24, %v760_v12  ;;  %v773_v43 = vadd.f32 %v771_v25, %v761_v13  ;;  %v782_v46 = vmul.f32 %v781_v27, %v2190_v34  ;;  %v783_v47 = vmul.f32 %v781_v27, %v2192_v35 }
  0xd9   : > { %v787_v54 = vstv %s2414_s19  ;;  %v793_v55 = vstv %s2416_s1  ;;  %v778_v58 = vadd.f32 %v776_v44, %v766_v36  ;;  %v779_v59 = vadd.f32 %v777_v45, %v767_v37  ;;  %s2502_s19 = sld [smem:[#allocation11 + $0x5]]  ;;  %s2504_s1 = sld [smem:[#allocation10 + $0x281]] }
  0xda   : > { %v788_v60 = vmul.f32 %v787_v54, %v2210_v48  ;;  %v789_v61 = vmul.f32 %v787_v54, %v2212_v49  ;;  %v784_v62 = vadd.f32 %v782_v46, %v772_v42  ;;  %v785_v63 = vadd.f32 %v783_v47, %v773_v43 }
  0xdb   : > { %v794_v0 = vmul.f32 %v793_v55, %v2226_v6  ;;  %v795_v10 = vmul.f32 %v793_v55, %v2228_v7  ;;  %v799_v12 = vstv %s2426_s24  ;;  %v805_v13 = vstv %s2428_s25  ;;  %s2510_s24 = sld [smem:[#allocation10 + $0x282]]  ;;  %s2512_s25 = sld [smem:[#allocation10 + $0x283]] }
  0xdc   : > { %v790_v1 = vadd.f32 %v788_v60, %v778_v58  ;;  %v791_v11 = vadd.f32 %v789_v61, %v779_v59  ;;  %v800_v16 = vmul.f32 %v799_v12, %v2240_v18  ;;  %v801_v17 = vmul.f32 %v799_v12, %v2242_v19 }
  0xdd   : > { %v796_v14 = vadd.f32 %v794_v0, %v784_v62  ;;  %v797_v15 = vadd.f32 %v795_v10, %v785_v63  ;;  %v806_v22 = vmul.f32 %v805_v13, %v2258_v30  ;;  %v807_v23 = vmul.f32 %v805_v13, %v2260_v31 }
  0xde   : > { %v815_v24 = vstv %s2440_s22  ;;  %v819_v25 = vstv %s2442_s9  ;;  %v802_v26 = vadd.f32 %v800_v16, %v790_v1  ;;  %v803_v27 = vadd.f32 %v801_v17, %v791_v11  ;;  %s2522_s22 = sld [smem:[#allocation10 + $0x284]]  ;;  %s2524_s9 = sld [smem:[#allocation10 + $0x285]] }
  0xdf   : > { %v816_v36 = vmul.f32 %v815_v24, %v2112_v32  ;;  %v817_v37 = vmul.f32 %v815_v24, %v2114_v33  ;;  %v808_v42 = vadd.f32 %v806_v22, %v796_v14  ;;  %v809_v43 = vadd.f32 %v807_v23, %v797_v15 }
  0xe0   : > { %v823_v44 = vstv %s2448_s23  ;;  %v827_v45 = vstv %s2450_s2  ;;  %v833_v62 = vstv %s2458_s21  ;;  %v839_v63 = vstv %s2460_s30  ;;  %s2534_s23 = sld [smem:[#allocation10 + $0x286]]  ;;  %s2536_s2 = sld [smem:[#allocation10 + $0x287]] }
  0xe1   : > { %v820_v46 = vadd.f32 %v819_v25, %v816_v36  ;;  %v821_v47 = vadd.f32 %v819_v25, %v817_v37  ;;  %v824_v54 = vmul.f32 %v823_v44, %v2122_v40  ;;  %v825_v55 = vmul.f32 %v823_v44, %v2124_v41  ;;  %s2538_s21 = sld [smem:[#allocation10 + $0x288]]  ;;  %s2540_s30 = sld [smem:[#allocation10 + $0x289]] }
  0xe2   : > { %v2490_v58 = vadd.f32 %v808_v42, %v802_v26  ;;  %v2492_v59 = vadd.f32 %v809_v43, %v803_v27  ;;  %v828_v60 = vmul.f32 %v827_v45, %v2138_v52  ;;  %v829_v61 = vmul.f32 %v827_v45, %v2140_v53 }
  0xe3   : > { %v845_v0 = vstv %s2464_s12  ;;  %v851_v10 = vstv %s2466_s13  ;;  %v834_v14 = vmul.f32 %v833_v62, %v2162_v8  ;;  %v835_v15 = vmul.f32 %v833_v62, %v2164_v9  ;;  %s2556_s12 = sld [smem:[#allocation10 + $0x300]]  ;;  %s2558_s13 = sld [smem:[#allocation11 + $0x6]] }
  0xe4   : > { %v830_v12 = vadd.f32 %v828_v60, %v820_v46  ;;  %v831_v13 = vadd.f32 %v829_v61, %v821_v47  ;;  %v840_v16 = vmul.f32 %v839_v63, %v2176_v20  ;;  %v841_v17 = vmul.f32 %v839_v63, %v2178_v21 }
  0xe5   : > { %v846_v22 = vmul.f32 %v845_v0, %v2190_v34  ;;  %v847_v23 = vmul.f32 %v845_v0, %v2192_v35  ;;  %v852_v24 = vmul.f32 %v851_v10, %v2210_v48  ;;  %v853_v25 = vmul.f32 %v851_v10, %v2212_v49 }
  0xe6   : > { %v836_v26 = vadd.f32 %v834_v14, %v824_v54  ;;  %v837_v27 = vadd.f32 %v835_v15, %v825_v55  ;;  %v842_v36 = vadd.f32 %v840_v16, %v830_v12  ;;  %v843_v37 = vadd.f32 %v841_v17, %v831_v13 }
  0xe7   : > { %v857_v42 = vstv %s2478_s16  ;;  %v863_v43 = vstv %s2480_s10  ;;  %v869_v44 = vstv %s2484_s17  ;;  %v879_v45 = vstv %s2486_s20  ;;  %s2562_s16 = sld [smem:[#allocation10 + $0x301]]  ;;  %s2564_s10 = sld [smem:[#allocation10 + $0x302]] }
  0xe8   : > { %v848_v46 = vadd.f32 %v846_v22, %v836_v26  ;;  %v849_v47 = vadd.f32 %v847_v23, %v837_v27  ;;  %v854_v60 = vadd.f32 %v852_v24, %v842_v36  ;;  %v855_v61 = vadd.f32 %v853_v25, %v843_v37  ;;  %s2576_s17 = sld [smem:[#allocation10 + $0x303]]  ;;  %s2578_s20 = sld [smem:[#allocation10 + $0x304]] }
  0xe9   : > { %v858_v62 = vmul.f32 %v857_v42, %v2226_v6  ;;  %v859_v54 = vmul.f32 %v857_v42, %v2228_v7  ;;  %v864_v55 = vmul.f32 %v863_v43, %v2240_v18  ;;  %v865_v63 = vmul.f32 %v863_v43, %v2242_v19 }
  0xea   : > { %v870_v0 = vmul.f32 %v869_v44, %v2258_v30  ;;  %v871_v10 = vmul.f32 %v869_v44, %v2260_v31  ;;  %v880_v12 = vmul.f32 %v879_v45, %v2112_v32  ;;  %v881_v13 = vmul.f32 %v879_v45, %v2114_v33 }
  0xeb   : > { %v860_v14 = vadd.f32 %v858_v62, %v848_v46  ;;  %v861_v15 = vadd.f32 %v859_v54, %v849_v47  ;;  %v866_v16 = vadd.f32 %v864_v55, %v854_v60  ;;  %v867_v17 = vadd.f32 %v865_v63, %v855_v61 }
  0xec   : > { %v883_v22 = vstv %s2502_s19  ;;  %v887_v23 = vstv %s2504_s1  ;;  %v891_v24 = vstv %s2510_s24  ;;  %v897_v25 = vstv %s2512_s25  ;;  %s2588_s19 = sld [smem:[#allocation10 + $0x305]]  ;;  %s2590_s1 = sld [smem:[#allocation10 + $0x306]] }
  0xed   : > { %v872_v26 = vadd.f32 %v870_v0, %v860_v14  ;;  %v873_v27 = vadd.f32 %v871_v10, %v861_v15  ;;  %v884_v36 = vadd.f32 %v883_v22, %v880_v12  ;;  %v885_v37 = vadd.f32 %v883_v22, %v881_v13  ;;  %s2596_s24 = sld [smem:[#allocation10 + $0x307]]  ;;  %s2598_s25 = sld [smem:[#allocation10 + $0x308]] }
  0xee   : > { %v888_v42 = vmul.f32 %v887_v23, %v2122_v40  ;;  %v889_v43 = vmul.f32 %v887_v23, %v2124_v41  ;;  %v892_v44 = vmul.f32 %v891_v24, %v2138_v52  ;;  %v893_v45 = vmul.f32 %v891_v24, %v2140_v53 }
  0xef   : > { %v2550_v46 = vadd.f32 %v872_v26, %v866_v16  ;;  %v2552_v47 = vadd.f32 %v873_v27, %v867_v17  ;;  %v898_v60 = vmul.f32 %v897_v25, %v2162_v8  ;;  %v899_v61 = vmul.f32 %v897_v25, %v2164_v9 }
  0xf0   : > { %v894_v62 = vadd.f32 %v892_v44, %v884_v36  ;;  %v895_v54 = vadd.f32 %v893_v45, %v885_v37  ;;  %v903_v55 = vstv %s2522_s22  ;;  %v909_v63 = vstv %s2524_s9  ;;  %s2612_s22 = sld [smem:[#allocation10 + $0x309]]  ;;  %s2614_s9 = sld [smem:[#allocation10 + $0x380]] }
  0xf1   : > { %v900_v12 = vadd.f32 %v898_v60, %v888_v42  ;;  %v901_v13 = vadd.f32 %v899_v61, %v889_v43  ;;  %v904_v14 = vmul.f32 %v903_v55, %v2176_v20  ;;  %v905_v15 = vmul.f32 %v903_v55, %v2178_v21 }
  0xf2   : > { %v910_v16 = vmul.f32 %v909_v63, %v2190_v34  ;;  %v911_v17 = vmul.f32 %v909_v63, %v2192_v35  ;;  %v915_v22 = vstv %s2534_s23  ;;  %v921_v23 = vstv %s2536_s2  ;;  %s2622_s23 = sld [smem:[#allocation11 + $0x7]]  ;;  %s2624_s2 = sld [smem:[#allocation10 + $0x381]] }
  0xf3   : > { %v927_v24 = vstv %s2538_s21  ;;  %v933_v25 = vstv %s2540_s30  ;;  %v906_v26 = vadd.f32 %v904_v14, %v894_v62  ;;  %v907_v27 = vadd.f32 %v905_v15, %v895_v54  ;;  %s2630_s21 = sld [smem:[#allocation10 + $0x382]]  ;;  %s2632_s30 = sld [smem:[#allocation10 + $0x383]] }
  0xf4   : > { %v912_v36 = vadd.f32 %v910_v16, %v900_v12  ;;  %v913_v37 = vadd.f32 %v911_v17, %v901_v13  ;;  %v916_v42 = vmul.f32 %v915_v22, %v2210_v48  ;;  %v917_v43 = vmul.f32 %v915_v22, %v2212_v49 }
  0xf5   : > { %v922_v44 = vmul.f32 %v921_v23, %v2226_v6  ;;  %v923_v45 = vmul.f32 %v921_v23, %v2228_v7  ;;  %v928_v60 = vmul.f32 %v927_v24, %v2240_v18  ;;  %v929_v61 = vmul.f32 %v927_v24, %v2242_v19 }
  0xf6   : > { %v934_v62 = vmul.f32 %v933_v25, %v2258_v30  ;;  %v935_v54 = vmul.f32 %v933_v25, %v2260_v31  ;;  %v918_v55 = vadd.f32 %v916_v42, %v906_v26  ;;  %v919_v63 = vadd.f32 %v917_v43, %v907_v27 }
  0xf7   : > { %v924_v12 = vadd.f32 %v922_v44, %v912_v36  ;;  %v925_v13 = vadd.f32 %v923_v45, %v913_v37  ;;  %v943_v14 = vstv %s2556_s12  ;;  %v947_v15 = vstv %s2558_s13  ;;  %s2640_s12 = sld [smem:[#allocation10 + $0x384]]  ;;  %s2642_s13 = sld [smem:[#allocation10 + $0x385]] }
  0xf8   : > { %v951_v16 = vstv %s2562_s16  ;;  %v955_v17 = vstv %s2564_s10  ;;  %v930_v22 = vadd.f32 %v928_v60, %v918_v55  ;;  %v931_v23 = vadd.f32 %v929_v61, %v919_v63  ;;  %s2650_s16 = sld [smem:[#allocation10 + $0x386]]  ;;  %s2652_s10 = sld [smem:[#allocation10 + $0x387]] }
  0xf9   : > { %v936_v24 = vadd.f32 %v934_v62, %v924_v12  ;;  %v937_v10 = vadd.f32 %v935_v54, %v925_v13  ;;  %v944_v25 = vmul.f32 %v943_v14, %v2112_v32  ;;  %v945_v26 = vmul.f32 %v943_v14, %v2114_v33 }
  0xfa   : > { %v952_v27 = vmul.f32 %v951_v16, %v2122_v40  ;;  %v953_v36 = vmul.f32 %v951_v16, %v2124_v41  ;;  %v956_v43 = vmul.f32 %v955_v17, %v2138_v52  ;;  %v957_v44 = vmul.f32 %v955_v17, %v2140_v53 }
  0xfb   : > { %v2604_v37 = vadd.f32 %v936_v24, %v930_v22  ;;  %v2606_v42 = vadd.f32 %v937_v10, %v931_v23  ;;  %v948_v45 = vadd.f32 %v947_v15, %v944_v25  ;;  %v949_v60 = vadd.f32 %v947_v15, %v945_v26 }
  0xfc   : > { %v961_v61 = vstv %s2576_s17  ;;  %v967_v62 = vstv %s2578_s20  ;;  %v973_v22 = vstv %s2588_s19  ;;  %v979_v23 = vstv %s2590_s1  ;;  %s2662_s17 = sld [smem:[#allocation10 + $0x388]]  ;;  %s2664_s20 = sld [smem:[#allocation10 + $0x389]] }
  0xfd   : > { %v962_v10 = vmul.f32 %v961_v61, %v2162_v8  ;;  %v963_v63 = vmul.f32 %v961_v61, %v2164_v9  ;;  %v958_v12 = vadd.f32 %v956_v43, %v948_v45  ;;  %v959_v13 = vadd.f32 %v957_v44, %v949_v60  ;;  %s2676_s19 = sld [smem:[#allocation10 + $0x400]] }
  0xfe   : > { %v968_v14 = vmul.f32 %v967_v62, %v2176_v20  ;;  %v969_v15 = vmul.f32 %v967_v62, %v2178_v21  ;;  %v974_v26 = vmul.f32 %v973_v22, %v2190_v34  ;;  %v975_v43 = vmul.f32 %v973_v22, %v2192_v35  ;;  %s2678_s1 = sld [smem:[#allocation11 + $0x8]] }
  0xff   : > { %v964_v16 = vadd.f32 %v962_v10, %v952_v27  ;;  %v965_v17 = vadd.f32 %v963_v63, %v953_v36  ;;  %v980_v44 = vmul.f32 %v979_v23, %v2210_v48  ;;  %v981_v45 = vmul.f32 %v979_v23, %v2212_v49 }
 0x100   : > { %v970_v24 = vadd.f32 %v968_v14, %v958_v12  ;;  %v971_v25 = vadd.f32 %v969_v15, %v959_v13  ;;  %v985_v27 = vstv %s2596_s24  ;;  %v991_v36 = vstv %s2598_s25  ;;  %s2684_s24 = sld [smem:[#allocation10 + $0x401]]  ;;  %s2686_s25 = sld [smem:[#allocation10 + $0x402]] }
 0x101   : > { %v976_v60 = vadd.f32 %v974_v26, %v964_v16  ;;  %v977_v61 = vadd.f32 %v975_v43, %v965_v17  ;;  %v986_v62 = vmul.f32 %v985_v27, %v2226_v6  ;;  %v987_v10 = vmul.f32 %v985_v27, %v2228_v7 }
 0x102   : > { %v982_v63 = vadd.f32 %v980_v44, %v970_v24  ;;  %v983_v12 = vadd.f32 %v981_v45, %v971_v25  ;;  %v992_v13 = vmul.f32 %v991_v36, %v2240_v18  ;;  %v993_v14 = vmul.f32 %v991_v36, %v2242_v19 }
 0x103   : > { %v988_v15 = vadd.f32 %v986_v62, %v976_v60  ;;  %v989_v22 = vadd.f32 %v987_v10, %v977_v61  ;;  %v997_v16 = vstv %s2612_s22  ;;  %v1007_v17 = vstv %s2614_s9  ;;  %s2694_s22 = sld [smem:[#allocation10 + $0x403]]  ;;  %s2696_s9 = sld [smem:[#allocation10 + $0x404]] }
 0x104   : > { %v994_v23 = vadd.f32 %v992_v13, %v982_v63  ;;  %v995_v26 = vadd.f32 %v993_v14, %v983_v12  ;;  %v998_v43 = vmul.f32 %v997_v16, %v2258_v30  ;;  %v999_v27 = vmul.f32 %v997_v16, %v2260_v31 }
 0x105   : > { %v1008_v24 = vmul.f32 %v1007_v17, %v2112_v32  ;;  %v1009_v25 = vmul.f32 %v1007_v17, %v2114_v33  ;;  %v1011_v44 = vstv %s2622_s23  ;;  %v1015_v45 = vstv %s2624_s2  ;;  %s2700_s23 = sld [smem:[#allocation10 + $0x405]]  ;;  %s2702_s2 = sld [smem:[#allocation10 + $0x406]] }
 0x106   : > { %v1000_v36 = vadd.f32 %v998_v43, %v988_v15  ;;  %v1001_v60 = vadd.f32 %v999_v27, %v989_v22  ;;  %v1016_v61 = vmul.f32 %v1015_v45, %v2122_v40  ;;  %v1017_v62 = vmul.f32 %v1015_v45, %v2124_v41 }
 0x107   : > { %v1012_v10 = vadd.f32 %v1011_v44, %v1008_v24  ;;  %v1013_v63 = vadd.f32 %v1011_v44, %v1009_v25  ;;  %v1019_v12 = vstv %s2630_s21  ;;  %v1025_v13 = vstv %s2632_s30  ;;  %s2714_s21 = sld [smem:[#allocation10 + $0x407]]  ;;  %s2716_s30 = sld [smem:[#allocation10 + $0x408]] }
 0x108   : > { %v2666_v14 = vadd.f32 %v1000_v36, %v994_v23  ;;  %v2668_v16 = vadd.f32 %v1001_v60, %v995_v26  ;;  %v1020_v15 = vmul.f32 %v1019_v12, %v2138_v52  ;;  %v1021_v22 = vmul.f32 %v1019_v12, %v2140_v53 }
 0x109   : > { %v1026_v17 = vmul.f32 %v1025_v13, %v2162_v8  ;;  %v1027_v43 = vmul.f32 %v1025_v13, %v2164_v9  ;;  %v1031_v27 = vstv %s2640_s12  ;;  %v1037_v24 = vstv %s2642_s13  ;;  %s2720_s12 = sld [smem:[#allocation10 + $0x409]]  ;;  %s2722_s13 = sld [smem:[#allocation10 + $0x480]] }
 0x10a   : > { %v1022_v25 = vadd.f32 %v1020_v15, %v1012_v10  ;;  %v1023_v44 = vadd.f32 %v1021_v22, %v1013_v63  ;;  %v1032_v60 = vmul.f32 %v1031_v27, %v2176_v20  ;;  %v1033_v12 = vmul.f32 %v1031_v27, %v2178_v21 }
 0x10b   : > { %v1028_v45 = vadd.f32 %v1026_v17, %v1016_v61  ;;  %v1029_v36 = vadd.f32 %v1027_v43, %v1017_v62  ;;  %v1038_v13 = vmul.f32 %v1037_v24, %v2190_v34  ;;  %v1039_v55 = vmul.f32 %v1037_v24, %v2192_v35 }
 0x10c   : > { %v1043_v54 = vstv %s2650_s16  ;;  %v1049_v23 = vstv %s2652_s10  ;;  %v1034_v10 = vadd.f32 %v1032_v60, %v1022_v25  ;;  %v1035_v63 = vadd.f32 %v1033_v12, %v1023_v44  ;;  %s2738_s16 = sld [smem:[#allocation11 + $0x9]] }
 0x10d   : > { %v1044_v61 = vmul.f32 %v1043_v54, %v2210_v48  ;;  %v1045_v62 = vmul.f32 %v1043_v54, %v2212_v49  ;;  %v1040_v15 = vadd.f32 %v1038_v13, %v1028_v45  ;;  %v1041_v22 = vadd.f32 %v1039_v55, %v1029_v36  ;;  %s2740_s10 = sld [smem:[#allocation10 + $0x481]] }
 0x10e   : > { %v1050_v17 = vmul.f32 %v1049_v23, %v2226_v6  ;;  %v1051_v43 = vmul.f32 %v1049_v23, %v2228_v7  ;;  %v1055_v25 = vstv %s2662_s17  ;;  %v1061_v54 = vstv %s2664_s20  ;;  %s2746_s17 = sld [smem:[#allocation10 + $0x482]]  ;;  %s2748_s20 = sld [smem:[#allocation10 + $0x483]] }
 0x10f   : > { %v1046_v27 = vadd.f32 %v1044_v61, %v1034_v10  ;;  %v1047_v24 = vadd.f32 %v1045_v62, %v1035_v63  ;;  %v1056_v45 = vmul.f32 %v1055_v25, %v2240_v18  ;;  %v1057_v55 = vmul.f32 %v1055_v25, %v2242_v19 }
 0x110   : > { %v1052_v44 = vadd.f32 %v1050_v17, %v1040_v15  ;;  %v1053_v60 = vadd.f32 %v1051_v43, %v1041_v22  ;;  %v1062_v36 = vmul.f32 %v1061_v54, %v2258_v30  ;;  %v1063_v23 = vmul.f32 %v1061_v54, %v2260_v31 }
 0x111   : > { %v1071_v12 = vstv %s2676_s19  ;;  %v1075_v13 = vstv %s2678_s1  ;;  %v1058_v26 = vadd.f32 %v1056_v45, %v1046_v27  ;;  %v1059_v0 = vadd.f32 %v1057_v55, %v1047_v24  ;;  %s2758_s19 = sld [smem:[#allocation10 + $0x484]]  ;;  %s2760_s1 = sld [smem:[#allocation10 + $0x485]] }
 0x112   : > { %v1072_v10 = vmul.f32 %v1071_v12, %v2112_v32  ;;  %v1073_v63 = vmul.f32 %v1071_v12, %v2114_v33  ;;  %v1064_v61 = vadd.f32 %v1062_v36, %v1052_v44  ;;  %v1065_v62 = vadd.f32 %v1063_v23, %v1053_v60 }
 0x113   : > { %v1079_v15 = vstv %s2684_s24  ;;  %v1083_v22 = vstv %s2686_s25  ;;  %v1089_v45 = vstv %s2694_s22  ;;  %v1095_v55 = vstv %s2696_s9  ;;  %s2770_s24 = sld [smem:[#allocation10 + $0x486]]  ;;  %s2772_s25 = sld [smem:[#allocation10 + $0x487]] }
 0x114   : > { %v1076_v17 = vadd.f32 %v1075_v13, %v1072_v10  ;;  %v1077_v43 = vadd.f32 %v1075_v13, %v1073_v63  ;;  %v1080_v27 = vmul.f32 %v1079_v15, %v2122_v40  ;;  %v1081_v24 = vmul.f32 %v1079_v15, %v2124_v41  ;;  %s2774_s22 = sld [smem:[#allocation10 + $0x488]]  ;;  %s2776_s9 = sld [smem:[#allocation10 + $0x489]] }
 0x115   : > { %v2726_v25 = vadd.f32 %v1064_v61, %v1058_v26  ;;  %v2728_v54 = vadd.f32 %v1065_v62, %v1059_v0  ;;  %v1084_v44 = vmul.f32 %v1083_v22, %v2138_v52  ;;  %v1085_v60 = vmul.f32 %v1083_v22, %v2140_v53 }
 0x116   : > { %v1101_v36 = vstv %s2700_s23  ;;  %v1107_v23 = vstv %s2702_s2  ;;  %v1090_v0 = vmul.f32 %v1089_v45, %v2162_v8  ;;  %v1091_v26 = vmul.f32 %v1089_v45, %v2164_v9  ;;  %s2792_s23 = sld [smem:[#allocation13]]  ;;  %s2794_s2 = sld [smem:[#allocation2]] }
 0x117   : > { %v1086_v10 = vadd.f32 %v1084_v44, %v1076_v17  ;;  %v1087_v63 = vadd.f32 %v1085_v60, %v1077_v43  ;;  %v1096_v61 = vmul.f32 %v1095_v55, %v2176_v20  ;;  %v1097_v62 = vmul.f32 %v1095_v55, %v2178_v21 }
 0x118   : > { %v1102_v15 = vmul.f32 %v1101_v36, %v2190_v34  ;;  %v1103_v22 = vmul.f32 %v1101_v36, %v2192_v35  ;;  %v1108_v17 = vmul.f32 %v1107_v23, %v2210_v48  ;;  %v1109_v43 = vmul.f32 %v1107_v23, %v2212_v49 }
 0x119   : > { %v1092_v44 = vadd.f32 %v1090_v0, %v1080_v27  ;;  %v1093_v60 = vadd.f32 %v1091_v26, %v1081_v24  ;;  %v1098_v45 = vadd.f32 %v1096_v61, %v1086_v10  ;;  %v1099_v13 = vadd.f32 %v1097_v62, %v1087_v63 }
 0x11a   : > { %v1113_v12 = vstv %s2714_s21  ;;  %v1119_v11 = vstv %s2716_s30  ;;  %v1125_v1 = vstv %s2720_s12  ;;  %v1135_v55 = vstv %s2722_s13  ;;  %s2798_s21 = sld [smem:[#allocation13 + $0x1]]  ;;  %s2800_s30 = sld [smem:[#allocation13 + $0x2]] }
 0x11b   : > { %v1104_v29 = vadd.f32 %v1102_v15, %v1092_v44  ;;  %v1105_v28 = vadd.f32 %v1103_v22, %v1093_v60  ;;  %v1110_v5 = vadd.f32 %v1108_v17, %v1098_v45  ;;  %v1111_v4 = vadd.f32 %v1109_v43, %v1099_v13  ;;  %s2812_s12 = sld [smem:[#allocation13 + $0x3]]  ;;  %s2814_s13 = sld [smem:[#allocation13 + $0x4]] }
 0x11c   : > { %v1114_v36 = vmul.f32 %v1113_v12, %v2226_v6  ;;  %v1115_v27 = vmul.f32 %v1113_v12, %v2228_v7  ;;  %v1120_v24 = vmul.f32 %v1119_v11, %v2240_v18  ;;  %v1121_v23 = vmul.f32 %v1119_v11, %v2242_v19 }
 0x11d   : > { %v1126_v10 = vmul.f32 %v1125_v1, %v2258_v30  ;;  %v1127_v13 = vmul.f32 %v1125_v1, %v2260_v31  ;;  %v1136_v63 = vmul.f32 %v1135_v55, %v2112_v32  ;;  %v1137_v0 = vmul.f32 %v1135_v55, %v2114_v33 }
 0x11e   : > { %v1116_v12 = vadd.f32 %v1114_v36, %v1104_v29  ;;  %v1117_v26 = vadd.f32 %v1115_v27, %v1105_v28  ;;  %v1122_v61 = vadd.f32 %v1120_v24, %v1110_v5  ;;  %v1123_v62 = vadd.f32 %v1121_v23, %v1111_v4 }
 0x11f   : > { %v1139_v11 = vstv %s2738_s16  ;;  %v1143_v15 = vstv %s2740_s10  ;;  %v1147_v22 = vstv %s2746_s17  ;;  %v1153_v1 = vstv %s2748_s20  ;;  %s2824_s16 = sld [smem:[#allocation13 + $0x5]]  ;;  %s2826_s10 = sld [smem:[#allocation13 + $0x6]] }
 0x120   : > { %v1128_v17 = vadd.f32 %v1126_v10, %v1116_v12  ;;  %v1129_v32 = vadd.f32 %v1127_v13, %v1117_v26  ;;  %v1140_v33 = vadd.f32 %v1139_v11, %v1136_v63  ;;  %v1141_v43 = vadd.f32 %v1139_v11, %v1137_v0  ;;  %s2832_s17 = sld [smem:[#allocation13 + $0x7]]  ;;  %s2834_s20 = sld [smem:[#allocation13 + $0x8]] }
 0x121   : > { %v1144_v44 = vmul.f32 %v1143_v15, %v2122_v40  ;;  %v1145_v28 = vmul.f32 %v1143_v15, %v2124_v41  ;;  %v1148_v4 = vmul.f32 %v1147_v22, %v2138_v52  ;;  %v1149_v5 = vmul.f32 %v1147_v22, %v2140_v53 }
 0x122   : > { %v2786_v29 = vadd.f32 %v1128_v17, %v1122_v61  ;;  %v2788_v60 = vadd.f32 %v1129_v32, %v1123_v62  ;;  %v1154_v45 = vmul.f32 %v1153_v1, %v2162_v8  ;;  %v1155_v55 = vmul.f32 %v1153_v1, %v2164_v9 }
 0x123   : > { %v1150_v40 = vadd.f32 %v1148_v4, %v1140_v33  ;;  %v1151_v41 = vadd.f32 %v1149_v5, %v1141_v43  ;;  %v1159_v52 = vstv %s2758_s19  ;;  %v1165_v53 = vstv %s2760_s1  ;;  %s2850_s19 = sld [smem:[#allocation13 + $0x9]]  ;;  %s1419_s1 = sshll.u32 %s2042_s18, 4 }
 0x124   : > { %v1132_v8 = vmax.f32 %v2786_v29, 0.0  ;;  %v1133_v9 = vmax.f32 %v2788_v60, 0.0  ;;  %v1156_v36 = vadd.f32 %v1154_v45, %v1144_v44  ;;  %v1157_v27 = vadd.f32 %v1155_v55, %v1145_v28 }
 0x125   : > { %v1160_v24 = vmul.f32 %v1159_v52, %v2176_v20  ;;  %v1161_v23 = vmul.f32 %v1159_v52, %v2178_v21  ;;  %v1166_v10 = vmul.f32 %v1165_v53, %v2190_v34  ;;  %v1167_v13 = vmul.f32 %v1165_v53, %v2192_v35 }
 0x126   : > { %v1171_v63 = vstv %s2770_s24  ;;  %v1177_v0 = vstv %s2772_s25  ;;  %v1183_v12 = vstv %s2774_s22  ;;  %v1189_v26 = vstv %s2776_s9  ;;  %s1573_s24 = sshll.u32 %s1918_s6, 8  ;;  %s390_s25 = scalar_lea.vmem [#allocation14], %s1419_s1 }
 0x127   : > { %v1162_v61 = vadd.f32 %v1160_v24, %v1150_v40  ;;  %v1163_v62 = vadd.f32 %v1161_v23, %v1151_v41  ;;  %v1168_v11 = vadd.f32 %v1166_v10, %v1156_v36  ;;  %v1169_v15 = vadd.f32 %v1167_v13, %v1157_v27  ;;  %s1276_s22 = sshll.u32 %s390_s25, 4  ;;  %s2888_s22 = int_to_ptr.vmem [resolvable:$true] %s1276_s22 }
 0x128   : > { %v1172_v20 = vmul.f32 %v1171_v63, %v2210_v48  ;;  %v1173_v21 = vmul.f32 %v1171_v63, %v2212_v49  ;;  %v1178_v34 = vmul.f32 %v1177_v0, %v2226_v6  ;;  %v1179_v35 = vmul.f32 %v1177_v0, %v2228_v7  ;;  %s1758_s6 = scalar_lea.vmem %s2888_s22, 256 }
 0x129   : > { %v1184_v22 = vmul.f32 %v1183_v12, %v2240_v18  ;;  %v1185_v1 = vmul.f32 %v1183_v12, %v2242_v19  ;;  %v1190_v17 = vmul.f32 %v1189_v26, %v2258_v30  ;;  %v1191_v32 = vmul.f32 %v1189_v26, %v2260_v31  ;;  %p1759_p10 = scmp.ne.s32.totalorder %s2888_s22, %s1758_s6 }
 0x12a   : > { %v1174_v33 = vadd.f32 %v1172_v20, %v1162_v61  ;;  %v1175_v43 = vadd.f32 %v1173_v21, %v1163_v62  ;;  %v1180_v44 = vadd.f32 %v1178_v34, %v1168_v11  ;;  %v1181_v48 = vadd.f32 %v1179_v35, %v1169_v15 }
 0x12b   : > { %v1199_v49 = vstv %s2792_s23  ;;  %v1203_v6 = vstv %s2794_s2  ;;  %v1207_v28 = vstv %s2798_s21  ;;  %v1211_v7 = vstv %s2800_s30  ;;  %s2886_s2 = scalar_lea.hbm %s2938_s7, %s1573_s24  ;;  %s1263_s21 = scalar_lea.sflag [#allocation5], %s2042_s18 }
 0x12c   : > { %v1186_v4 = vadd.f32 %v1184_v22, %v1174_v33  ;;  %v1187_v18 = vadd.f32 %v1185_v1, %v1175_v43  ;;  %v1192_v19 = vadd.f32 %v1190_v17, %v1180_v44  ;;  %v1193_v30 = vadd.f32 %v1191_v32, %v1181_v48  ;;  %p1760_p6 = pnand %p1759_p10, %p2978_p5  ;;  %s1851_s30 = smov [#allocation14]  }
 0x12d   : > { %v1200_v31 = vmul.f32 %v1199_v49, %v620_v50  ;;  %v1201_v5 = vmul.f32 %v1199_v49, %v621_v51  ;;  %v2964_v45 = vmax.f32 %v2368_v56, 0.0  ;;  %v2965_v40 = vmax.f32 %v2370_v57, 0.0 }
 0x12e   : > { %v1194_v52 = vadd.f32 %v1192_v19, %v1186_v4  ;;  %v1195_v53 = vadd.f32 %v1193_v30, %v1187_v18  ;;  %v2966_v36 = vmax.f32 %v2430_v2, 0.0  ;;  %v2967_v24 = vmax.f32 %v2432_v3, 0.0  ;;  %p1761_p13 = pneg %p1760_p6 }
 0x12f   : > { %v1208_v55 = vmul.f32 %v1207_v28, %v2964_v45  ;;  %v1209_v41 = vmul.f32 %v1207_v28, %v2965_v40  ;;  %v1204_v38 = vadd.f32 %v1203_v6, %v1200_v31  ;;  %v1205_v50 = vadd.f32 %v1203_v6, %v1201_v5 }
 0x130   : > { %v1212_v27 = vmul.f32 %v1211_v7, %v2966_v36  ;;  %v1213_v23 = vmul.f32 %v1211_v7, %v2967_v24  ;;  %v1217_v39 = vstv %s2812_s12  ;;  %v1223_v51 = vstv %s2814_s13  ;;  %s1762_s12 = sshll.u32 %s1851_s30, 4  ;;  %s1763_s12 = int_to_ptr.vmem [resolvable:$false] %s1762_s12 }
 0x131   : > { %v1196_v56 = vmax.f32 %v1194_v52, 0.0  ;;  %v1197_v57 = vmax.f32 %v1195_v53, 0.0  ;;  %v2968_v10 = vmax.f32 %v2490_v58, 0.0  ;;  %v2969_v2 = vmax.f32 %v2492_v59, 0.0  ;;  %s1764_s13 = scalar_lea.vmem %s1763_s12, 512  ;;  %p1765_p1 = scmp.lt.s32.totalorder %s2888_s22, %s1763_s12 }
 0x132   : > { %v1214_v0 = vadd.f32 %v1212_v27, %v1204_v38  ;;  %v1215_v3 = vadd.f32 %v1213_v23, %v1205_v50  ;;  %v2970_v12 = vmax.f32 %v2550_v46, 0.0  ;;  %v2971_v61 = vmax.f32 %v2552_v47, 0.0  ;;  %p1766_p3 = scmp.lt.s32.totalorder %s1764_s13, %s1758_s6 }
 0x133   : > { %v1218_v13 = vmul.f32 %v1217_v39, %v2968_v10  ;;  %v1219_v63 = vmul.f32 %v1217_v39, %v2969_v2  ;;  %v1229_v20 = vstv %s2824_s16  ;;  %v1235_v21 = vstv %s2826_s10 }
 0x134   : > { %v1224_v26 = vmul.f32 %v1223_v51, %v2970_v12  ;;  %v1225_v62 = vmul.f32 %v1223_v51, %v2971_v61  ;;  %v2972_v59 = vmax.f32 %v2604_v37, 0.0  ;;  %v2973_v22 = vmax.f32 %v2606_v42, 0.0  ;;  %p1767_p0 = por %p1766_p3, %p1765_p1 }
 0x135   : > { %v1220_v11 = vadd.f32 %v1218_v13, %v1208_v55  ;;  %v1221_v15 = vadd.f32 %v1219_v63, %v1209_v41  ;;  %v2974_v46 = vmax.f32 %v2666_v14, 0.0  ;;  %v2975_v47 = vmax.f32 %v2668_v16, 0.0 }
 0x136   : > { %v1226_v58 = vadd.f32 %v1224_v26, %v1214_v0  ;;  %v1227_v34 = vadd.f32 %v1225_v62, %v1215_v3  ;;  %v1230_v35 = vmul.f32 %v1229_v20, %v2972_v59  ;;  %v1231_v1 = vmul.f32 %v1229_v20, %v2973_v22  ;;  %p1768_p2 = pnand %p1767_p0, %p1761_p13 }
 0x137   : > { %v1236_v17 = vmul.f32 %v1235_v21, %v2974_v46  ;;  %v1237_v32 = vmul.f32 %v1235_v21, %v2975_v47  ;;  %v1241_v33 = vstv %s2832_s17  ;;  %v1247_v43 = vstv %s2834_s20 }
 0x138   : > { %v1232_v44 = vadd.f32 %v1230_v35, %v1220_v11  ;;  %v1233_v48 = vadd.f32 %v1231_v1, %v1221_v15  ;;  %v2976_v49 = vmax.f32 %v2726_v25, 0.0  ;;  %v2977_v37 = vmax.f32 %v2728_v54, 0.0 }
 0x139   : > { %v1238_v42 = vadd.f32 %v1236_v17, %v1226_v58  ;;  %v1239_v7 = vadd.f32 %v1237_v32, %v1227_v34  ;;  %v1248_v14 = vmul.f32 %v1247_v43, %v1132_v8  ;;  %v1249_v16 = vmul.f32 %v1247_v43, %v1133_v9 }
 0x13a   : > { %v1242_v6 = vmul.f32 %v1241_v33, %v2976_v49  ;;  %v1243_v28 = vmul.f32 %v1241_v33, %v2977_v37  ;;  %v1253_v19 = vstv %s2850_s19 }
 0x13b   : > { %v1250_v30 = vadd.f32 %v1248_v14, %v1238_v42  ;;  %v1251_v31 = vadd.f32 %v1249_v16, %v1239_v7  ;;  %v1254_v5 = vmul.f32 %v1253_v19, %v1196_v56  ;;  %v1255_v25 = vmul.f32 %v1253_v19, %v1197_v57 }
 0x13c   : > { %v1244_v4 = vadd.f32 %v1242_v6, %v1232_v44  ;;  %v1245_v18 = vadd.f32 %v1243_v28, %v1233_v48 }
 0x13e   : > { %v1256_v54 = vadd.f32 %v1254_v5, %v1244_v4  ;;  %v1257_v45 = vadd.f32 %v1255_v25, %v1245_v18 }
 0x140   : > { %v1258_v29 = vadd.f32 %v1256_v54, %v1250_v30  ;;  %v1259_v60 = vadd.f32 %v1257_v45, %v1251_v31 }
 0x142   : > { %1260 = vst [vmem:[%s390_s25] sm:$0xff] %v1258_v29  ;;  %1261 = vst [vmem:[%s390_s25 + $0x8] sm:$0xff] %v1259_v60 }
 0x143   : > { %1771 = shalt.err (!%p1768_p2)
}
 0x144   : > { %s1772_s16 = scalar_lea.hbm %s2886_s2, 256  ;;  %s1776_s20 = scalar_lea.hbm %s2938_s7, 768 }
 0x145   : > { %p1773_p7 = scmp.ne.s32.totalorder %s2886_s2, %s1772_s16  ;;  %p1777_p9 = scmp.lt.u32.totalorder %s2886_s2, %s2938_s7 }
 0x146   : > { %p1778_p11 = scmp.lt.u32.totalorder %s1776_s20, %s1772_s16  ;;  %p1780_p10 = scmp.lt.u32.totalorder %s1772_s16, %s2886_s2 }
 0x147   : > { %p1774_p4 = pnand %p1773_p7, %p2978_p5 }
 0x148   : > { %p1779_p12 = por %p1778_p11, %p1777_p9 }
 0x149   : > { %p1775_p8 = pneg %p1774_p4 }
 0x14a   : > { %p1781_p6 = por %p1780_p10, %p1779_p12 }
 0x14c   : > { %p1782_p13 = pnand %p1781_p6, %p1775_p8 }
 0x14e   : > { %1785 = shalt.err (!%p1782_p13)
}
 0x14f   : > { %s1852_s24 = smov 128   ;;  %s1853_s25 = smov 8  }
 0x150   : > { %1603 = dma.vmem_to_hbm [thread:$0]  (%p2978_p5), %s2888_s22, 256, %s2886_s2, %s1263_s21, %s1852_s24, %s1852_s24, %s1853_s25  }
 0x151 PF: > { %p1635_p1 = scmp.ge.s32.totalorder %s1836_s29, 2  ;;  %s1291_s9 = sand.u32 1, %s1824_s26  }
 0x152   : > { %p2979_p3 = scmp.ne.s32.totalorder %s2949_s15, 0  ;;  %s1292_s23 = scalar_lea.sflag [#allocation5], %s1291_s9 }
 0x154   : > { %p1622_p0 = pnand %p1635_p1, %p2979_p3 }
 0x156   : > { %1819 = dma.done.wait (!%p1622_p0), %s1292_s23, 256  }
 0x157   : > { %1821 = vsyncadd (!%p1622_p0), %s1292_s23, 4294967040  ;;  %p24_p2 = scmp.ge.s32.totalorder %s1922_s8, 5   ;;  %s2980_s26 = smov %s1828_s27 }
 0x158   : > { %s2981_s27 = smov %s1832_s28  ;;  %s2982_s28 = smov %s1934_s11 }
 0x159   : > { %s2983_s29 = smov %s1922_s8  ;;  %26 = sbr.rel (!%p24_p2) target bundleno = 12 (0xc), region = 120 }
 0x160   :  { %1297 = vsyncpa [#allocation4], 1 }
 0x161   :  { %1299 = vsyncpa [#allocation4 + $0x1], 1 }
 0x162   :  { %1300 = vsyncpa [#allocation5], 1 }
 0x163   :  { %1302 = vsyncpa [#allocation5 + $0x1], 1 }
 0x164   :  { %1303 = vsyncpa [#allocation6], 1 }
 0x165   :  { %1305 = vsyncpa [#allocation6 + $0x1], 1 }
 0x166   :  { %1306 = vsyncpa [#allocation9], 1 }
 0x167   :  { %1307 = vsyncpa [#allocation12], 1 }

</bundles_post_ra>
